<compile_context>
chip_gen: v7x
topology: tpu7x:2x2x1
jax: 0.10.0
libtpu: 0.0.40
codegen_flags: <defaults>
</compile_context>

<pallas_src>
import functools
import math

import jax
import jax.numpy as jnp
from jax import lax
from jax.experimental import pallas as pl
from jax.experimental.pallas import tpu as pltpu

SIGMA = 10.0
SIGMA_COLOR = -1.0 / (2.0 * SIGMA * SIGMA)
SQRT_NEG_SIGMA_COLOR = math.sqrt(-SIGMA_COLOR)

# rgb2yCbCr constants (row k, col j): out[:, j] = sum_k x[:, k]*MAT[k][j] + BIAS[j]
MAT = ((0.257, -0.148, 0.439),
       (0.564, -0.291, -0.368),
       (0.098, 0.439, -0.071))
BIAS = (16.0 / 255.0, 128.0 / 255.0, 128.0 / 255.0)

# sqrt(-sigma_color) folded in once (Python constants -> folded at trace time).
MAT2 = tuple(tuple(MAT[k][j] * SQRT_NEG_SIGMA_COLOR for j in range(3))
             for k in range(3))
BIAS2 = tuple(b * SQRT_NEG_SIGMA_COLOR for b in BIAS)

# 12 unique (dh, dw) spatial offsets (w1, w3, ..., w23 of the reference).
# The even-indexed partner (w2, w4, ...) is the same pair with A/B swapped,
# i.e. an exact negation -> identical term under square/abs; counted twice.
UNIQUE_SHIFTS = ((1, 0), (0, 1), (-1, -1), (1, -1),
                 (2, 0), (0, 2), (-2, -1), (2, -1),
                 (-1, -2), (1, -2), (-2, -2), (2, -2))

# Full 24-pair list (only used by the plain-JAX reference checker).
_S = slice(None)
_P1, _M1 = slice(1, None), slice(None, -1)
_P2, _M2 = slice(2, None), slice(None, -2)
SHIFT_PAIRS = [
    ((_P1, _S), (_M1, _S)), ((_M1, _S), (_P1, _S)),
    ((_S, _P1), (_S, _M1)), ((_S, _M1), (_S, _P1)),
    ((_M1, _M1), (_P1, _P1)), ((_P1, _P1), (_M1, _M1)),
    ((_P1, _M1), (_M1, _P1)), ((_M1, _P1), (_P1, _M1)),
    ((_P2, _S), (_M2, _S)), ((_M2, _S), (_P2, _S)),
    ((_S, _P2), (_S, _M2)), ((_S, _M2), (_S, _P2)),
    ((_M2, _M1), (_P2, _P1)), ((_P2, _P1), (_M2, _M1)),
    ((_P2, _M1), (_M2, _P1)), ((_M2, _P1), (_P2, _M1)),
    ((_M1, _M2), (_P1, _P2)), ((_P1, _P2), (_M1, _M2)),
    ((_P1, _M2), (_M1, _P2)), ((_M1, _P2), (_P1, _M2)),
    ((_M2, _M2), (_P2, _P2)), ((_P2, _P2), (_M2, _M2)),
    ((_P2, _M2), (_M2, _P2)), ((_M2, _P2), (_P2, _M2)),
]


def _exact_divmod(v, d):
    """(v // d, v % d) for int32 v with 0 <= v < 2**24 and constant d >= 3.

    Uses a float reciprocal-multiply + floor with a single integer fix-up
    step: exact under the stated bounds, uses only ops that are guaranteed to
    lower on the TPU VPU (no vector integer division, no float-index hazard).
    """
    q = jnp.floor(v.astype(jnp.float32) * (1.0 / float(d))).astype(jnp.int32)
    r = v - q * d
    hi = (r >= d).astype(jnp.int32)
    lo = (r < 0).astype(jnp.int32)
    q = q + hi - lo
    r = r - d * hi + d * lo
    return q, r


def _loss_kernel(x_ref, o_ref, out_ref, *, N, H, W):
    """One batch element per grid step; writes that element's partial loss."""
    HW = H * W
    L = 3 * HW
    C = 128
    R = L // C            # rows of the per-batch slab
    RHW = HW // C         # rows per channel plane

    xf = x_ref[0]         # (R, 128) raw RGB, flat NCHW memory order
    of = o_ref[0]         # (R, 128) illumination / output, same layout

    # ---- iotas & lane-wrap masks (trace-time memoized) --------------------
    ri = lax.broadcasted_iota(jnp.int32, (R, C), 0)
    ci = lax.broadcasted_iota(jnp.int32, (R, C), 1)
    wrap_masks = {}       # lane offset r -> (ci < C - r)

    def lane_roll(a, r):  # out[., col] = a[., (col + r) % C]
        r = r % C
        return a if r == 0 else pltpu.roll(a, C - r, axis=1)

    def sub_roll(a, q):   # out[row, .] = a[(row + q) % R, .]
        q = q % R
        return a if q == 0 else pltpu.roll(a, R - q, axis=0)

    def flat_roll(a, s):
        """out[f] = a[(f + s) % L], with `a` the row-major (R, 128) slab."""
        s = s % L
        q, r = divmod(s, C)
        if r == 0:
            return sub_roll(a, q)
        lo = lane_roll(a, r)
        b1 = sub_roll(lo, q)       # lanes that did not wrap within the row
        b2 = sub_roll(lo, q + 1)   # wrapped lanes pull from the next row
        if r not in wrap_masks:
            wrap_masks[r] = ci < (C - r)
        return jnp.where(wrap_masks[r], b1, b2)

    # ---- fused rgb2yCbCr (sqrt(-sigma_color) pre-folded into MAT2/BIAS2) --
    # The reference flattens raw NCHW memory into rows of 3 *consecutive*
    # memory elements (NOT per-pixel RGB).  Flat element f uses its aligned
    # triple [f - f%3 .. f - f%3 + 2]:
    #   phase 0: M00*x[f]   + M10*x[f+1] + M20*x[f+2] + B0
    #   phase 1: M01*x[f-1] + M11*x[f]   + M21*x[f+1] + B1
    #   phase 2: M02*x[f-2] + M12*x[f-1] + M22*x[f]   + B2
    # phase = f % 3 = (2*row + col) % 3 since 128 == 2 (mod 3).
    _, phase = _exact_divmod(2 * ri + ci, 3)
    ph0 = phase == 0
    ph1 = phase == 1
    xp1 = flat_roll(xf, 1)
    xp2 = flat_roll(xf, 2)
    xm1 = flat_roll(xf, -1)
    xm2 = flat_roll(xf, -2)
    y0 = MAT2[0][0] * xf + MAT2[1][0] * xp1 + MAT2[2][0] * xp2 + BIAS2[0]
    y1 = MAT2[0][1] * xm1 + MAT2[1][1] * xf + MAT2[2][1] * xp1 + BIAS2[1]
    y2 = MAT2[0][2] * xm2 + MAT2[1][2] * xm1 + MAT2[2][2] * xf + BIAS2[2]
    ycc = jnp.where(ph0, y0, jnp.where(ph1, y1, y2))   # already * sqrt(-sigma)

    # ---- fidelity: 1.5 * MSE(illu, input) (partial sum for this element) --
    d = of - xf
    total = (1.5 / (N * L)) * jnp.sum(d * d)

    # ---- smoothness: 12 unique bilateral terms, each counted twice --------
    # Base-pixel validity masks hoisted out of the loop: 5 distinct row masks
    # + 5 distinct col masks, one AND per term inside the loop.
    rp = lax.broadcasted_iota(jnp.int32, (RHW, C), 0)
    cp = lax.broadcasted_iota(jnp.int32, (RHW, C), 1)
    prow, pcol = _exact_divmod(rp * C + cp, W)
    row_masks = {dh: (prow >= max(0, -dh)) & (prow < H - max(0, dh))
                 for dh in sorted({dh for dh, _ in UNIQUE_SHIFTS})}
    col_masks = {dw: (pcol >= max(0, -dw)) & (pcol < W - max(0, dw))
                 for dw in sorted({dw for _, dw in UNIQUE_SHIFTS})}

    # 4 partial accumulators -> short dependency chains across the EUP exp.
    accs = [jnp.zeros((RHW, C), jnp.float32) for _ in range(4)]
    for idx, (dh, dw) in enumerate(UNIQUE_SHIFTS):
        s = dh * W + dw                     # spatial offset == flat offset
        dy = flat_roll(ycc, s) - ycc        # (R, 128)
        do = flat_roll(of, s) - of
        dy2 = dy * dy
        da = jnp.abs(do)
        # channel sum == sum of the three plane-aligned row blocks
        wsum = dy2[:RHW] + dy2[RHW:2 * RHW] + dy2[2 * RHW:]
        g = da[:RHW] + da[RHW:2 * RHW] + da[2 * RHW:]
        count = (H - abs(dh)) * (W - abs(dw))
        log_scale = math.log(2.0 / (N * count))   # 2x: mirrored-term dedup
        term = jnp.exp(log_scale - wsum) * g
        mask = row_masks[dh] & col_masks[dw]
        accs[idx % 4] = accs[idx % 4] + jnp.where(mask, term, 0.0)

    total = total + jnp.sum((accs[0] + accs[1]) + (accs[2] + accs[3]))
    out_ref[...] = jnp.full((1, 1, 128), total, dtype=jnp.float32)


def _pick_vmem_limit():
    # v5e/v6e: 128 MiB physical VMEM (16/32 MiB default scoped) -> raise it.
    # v7x: only 64 MiB physical -> stay around 48 MiB.
    try:
        cap = pltpu.get_tpu_info().vmem_capacity_bytes
    except Exception:
        cap = 64 * 1024 * 1024
    return int(min(100 * 2 ** 20, max(32 * 2 ** 20, cap * 3 // 4)))


def loss_function(x, illu):
    """Pallas equivalent of LossFunction()(input=x, illu=illu) -> scalar."""
    x = x.astype(jnp.float32)
    illu = illu.astype(jnp.float32)
    n, c, h, w = x.shape
    assert c == 3
    assert min(h, w) >= 3
    hw = h * w
    # TODO(synk): pad the per-channel plane to a multiple of 128 for arbitrary
    # spatial sizes; multiples of 1024 are the fully (8,128)-aligned fast path.
    assert hw % 128 == 0, "H*W must be a multiple of 128"
    assert hw < 2 ** 24          # exactness bound of the in-kernel divmod
    L = 3 * hw
    R = L // 128

    # Free reshape: per-batch flat NCHW memory as a sublane+lane dense slab.
    xf = x.reshape(n, R, 128)
    of = illu.reshape(n, R, 128)

    kernel = functools.partial(_loss_kernel, N=n, H=h, W=w)
    partials = pl.pallas_call(
        kernel,
        out_shape=jax.ShapeDtypeStruct((n, 1, 128), jnp.float32),
        grid=(n,),
        in_specs=[pl.BlockSpec((1, R, 128), lambda i: (i, 0, 0)),
                  pl.BlockSpec((1, R, 128), lambda i: (i, 0, 0))],
        out_specs=pl.BlockSpec((1, 1, 128), lambda i: (i, 0, 0)),
        compiler_params=pltpu.CompilerParams(
            dimension_semantics=("parallel",),
            vmem_limit_bytes=_pick_vmem_limit()),
    )(xf, of)
    # per-batch partial losses -> scalar (tiny XLA reduce)
    return jnp.sum(partials[:, 0, 0])


def loss_function_ref(x, illu):
    """Plain-JAX reference mirroring the PyTorch code, for verification."""
    x = x.astype(jnp.float32)
    illu = illu.astype(jnp.float32)
    n, _, h, w = x.shape
    mat = jnp.array(MAT, jnp.float32)
    bias = jnp.array(BIAS, jnp.float32)
    ycc = (x.reshape(-1, 3) @ mat + bias).reshape(n, 3, h, w)
    total = 1.5 * jnp.mean((illu - x) ** 2)
    for (ha, wa), (hb, wb) in SHIFT_PAIRS:
        dy = ycc[:, :, ha, wa] - ycc[:, :, hb, wb]
        wgt = jnp.exp(jnp.sum(dy * dy, axis=1, keepdims=True) * SIGMA_COLOR)
        do = illu[:, :, ha, wa] - illu[:, :, hb, wb]
        g = jnp.sum(jnp.abs(do), axis=1, keepdims=True)
        total = total + jnp.mean(wgt * g)
    return total


if __name__ == "__main__":
    key = jax.random.PRNGKey(0)
    k1, k2 = jax.random.split(key)
    # 32x32 keeps H*W a multiple of 1024 -> fully (8,128)-aligned slabs.
    N, C, H, W = 2, 3, 32, 32
    x = jax.random.uniform(k1, (N, C, H, W), jnp.float32)       # RGB input
    illu = jax.random.uniform(k2, (N, C, H, W), jnp.float32)    # illumination

    out = jax.block_until_ready(jax.jit(loss_function)(x, illu))
    ref = jax.block_until_ready(loss_function_ref(x, illu))

    assert jnp.isfinite(out), "kernel produced non-finite loss"
    assert abs(float(out) - float(ref)) <= 2e-3 * (abs(float(ref)) + 1.0), (
        f"mismatch: kernel={float(out)} ref={float(ref)}")
    print("KERNEL_OK")
</pallas_src>

<mosaic_0001>
module attributes {stable_mosaic.version = 11 : i64} {
  func.func @_loss_kernel(%arg0: i32, %arg1: memref<1x24x128xf32, #tpu.memory_space<vmem>>, %arg2: memref<1x24x128xf32, #tpu.memory_space<vmem>>, %arg3: memref<1x1x128xf32, #tpu.memory_space<vmem>>) attributes {dimension_semantics = [#tpu.dimension_semantics<parallel>], iteration_bounds = array<i64: 2>, scalar_prefetch = 0 : i64, scratch_operands = 0 : i64, tpu.core_type = #tpu.core_type<tc>, window_params = [{transform_indices = @transform_0, window_bounds = array<i64: 1, 24, 128>}, {transform_indices = @transform_1, window_bounds = array<i64: 1, 24, 128>}, {transform_indices = @transform_2, window_bounds = array<i64: 1, 1, 128>}]} {
    %c0 = arith.constant 0 : index
    %c0_0 = arith.constant 0 : index
    %c0_1 = arith.constant 0 : index
    %0 = vector.load %arg1[%c0, %c0_0, %c0_1] : memref<1x24x128xf32, #tpu.memory_space<vmem>>, vector<1x24x128xf32>
    %1 = vector.shape_cast %0 : vector<1x24x128xf32> to vector<24x128xf32>
    %c0_2 = arith.constant 0 : index
    %c0_3 = arith.constant 0 : index
    %c0_4 = arith.constant 0 : index
    %2 = vector.load %arg2[%c0_2, %c0_3, %c0_4] : memref<1x24x128xf32, #tpu.memory_space<vmem>>, vector<1x24x128xf32>
    %3 = vector.shape_cast %2 : vector<1x24x128xf32> to vector<24x128xf32>
    %4 = tpu.iota {dimensions = array<i32: 0>} : vector<24x128xi32>
    %5 = tpu.iota {dimensions = array<i32: 1>} : vector<24x128xi32>
    %c2_i32 = arith.constant 2 : i32
    %6 = vector.broadcast %c2_i32 : i32 to vector<24x128xi32>
    %7 = arith.muli %6, %4 : vector<24x128xi32>
    %8 = arith.addi %7, %5 : vector<24x128xi32>
    %9 = arith.sitofp %8 : vector<24x128xi32> to vector<24x128xf32>
    %cst = arith.constant 0.333333343 : f32
    %10 = vector.broadcast %cst : f32 to vector<24x128xf32>
    %11 = arith.mulf %9, %10 : vector<24x128xf32>
    %12 = math.floor %11 : vector<24x128xf32>
    %13 = arith.fptosi %12 : vector<24x128xf32> to vector<24x128xi32>
    %c3_i32 = arith.constant 3 : i32
    %14 = vector.broadcast %c3_i32 : i32 to vector<24x128xi32>
    %15 = arith.muli %13, %14 : vector<24x128xi32>
    %16 = arith.subi %8, %15 : vector<24x128xi32>
    %c3_i32_5 = arith.constant 3 : i32
    %17 = vector.broadcast %c3_i32_5 : i32 to vector<24x128xi32>
    %18 = arith.cmpi sge, %16, %17 : vector<24x128xi32>
    %19 = arith.extui %18 : vector<24x128xi1> to vector<24x128xi32>
    %c0_i32 = arith.constant 0 : i32
    %20 = vector.broadcast %c0_i32 : i32 to vector<24x128xi32>
    %21 = arith.cmpi slt, %16, %20 : vector<24x128xi32>
    %22 = arith.extui %21 : vector<24x128xi1> to vector<24x128xi32>
    %c3_i32_6 = arith.constant 3 : i32
    %23 = vector.broadcast %c3_i32_6 : i32 to vector<24x128xi32>
    %24 = arith.muli %23, %19 : vector<24x128xi32>
    %25 = arith.subi %16, %24 : vector<24x128xi32>
    %c3_i32_7 = arith.constant 3 : i32
    %26 = vector.broadcast %c3_i32_7 : i32 to vector<24x128xi32>
    %27 = arith.muli %26, %22 : vector<24x128xi32>
    %28 = arith.addi %25, %27 : vector<24x128xi32>
    %c0_i32_8 = arith.constant 0 : i32
    %29 = vector.broadcast %c0_i32_8 : i32 to vector<24x128xi32>
    %30 = arith.cmpi eq, %28, %29 : vector<24x128xi32>
    %c1_i32 = arith.constant 1 : i32
    %31 = vector.broadcast %c1_i32 : i32 to vector<24x128xi32>
    %32 = arith.cmpi eq, %28, %31 : vector<24x128xi32>
    %c127_i32 = arith.constant 127 : i32
    %33 = tpu.dynamic_rotate %1 by %c127_i32 dim 1 : vector<24x128xf32>, i32 -> vector<24x128xf32>
    %c23_i32 = arith.constant 23 : i32
    %34 = tpu.dynamic_rotate %33 by %c23_i32 dim 0 : vector<24x128xf32>, i32 -> vector<24x128xf32>
    %c127_i32_9 = arith.constant 127 : i32
    %35 = vector.broadcast %c127_i32_9 : i32 to vector<24x128xi32>
    %36 = arith.cmpi slt, %5, %35 : vector<24x128xi32>
    %37 = arith.select %36, %33, %34 : vector<24x128xi1>, vector<24x128xf32>
    %c126_i32 = arith.constant 126 : i32
    %38 = tpu.dynamic_rotate %1 by %c126_i32 dim 1 : vector<24x128xf32>, i32 -> vector<24x128xf32>
    %c23_i32_10 = arith.constant 23 : i32
    %39 = tpu.dynamic_rotate %38 by %c23_i32_10 dim 0 : vector<24x128xf32>, i32 -> vector<24x128xf32>
    %c126_i32_11 = arith.constant 126 : i32
    %40 = vector.broadcast %c126_i32_11 : i32 to vector<24x128xi32>
    %41 = arith.cmpi slt, %5, %40 : vector<24x128xi32>
    %42 = arith.select %41, %38, %39 : vector<24x128xi1>, vector<24x128xf32>
    %c1_i32_12 = arith.constant 1 : i32
    %43 = tpu.dynamic_rotate %1 by %c1_i32_12 dim 1 : vector<24x128xf32>, i32 -> vector<24x128xf32>
    %c1_i32_13 = arith.constant 1 : i32
    %44 = tpu.dynamic_rotate %43 by %c1_i32_13 dim 0 : vector<24x128xf32>, i32 -> vector<24x128xf32>
    %c1_i32_14 = arith.constant 1 : i32
    %45 = vector.broadcast %c1_i32_14 : i32 to vector<24x128xi32>
    %46 = arith.cmpi slt, %5, %45 : vector<24x128xi32>
    %47 = arith.select %46, %44, %43 : vector<24x128xi1>, vector<24x128xf32>
    %c2_i32_15 = arith.constant 2 : i32
    %48 = tpu.dynamic_rotate %1 by %c2_i32_15 dim 1 : vector<24x128xf32>, i32 -> vector<24x128xf32>
    %c1_i32_16 = arith.constant 1 : i32
    %49 = tpu.dynamic_rotate %48 by %c1_i32_16 dim 0 : vector<24x128xf32>, i32 -> vector<24x128xf32>
    %c2_i32_17 = arith.constant 2 : i32
    %50 = vector.broadcast %c2_i32_17 : i32 to vector<24x128xi32>
    %51 = arith.cmpi slt, %5, %50 : vector<24x128xi32>
    %52 = arith.select %51, %49, %48 : vector<24x128xi1>, vector<24x128xf32>
    %cst_18 = arith.constant 0.0181726441 : f32
    %53 = vector.broadcast %cst_18 : f32 to vector<24x128xf32>
    %54 = arith.mulf %53, %1 : vector<24x128xf32>
    %cst_19 = arith.constant 0.0398808233 : f32
    %55 = vector.broadcast %cst_19 : f32 to vector<24x128xf32>
    %56 = arith.mulf %55, %37 : vector<24x128xf32>
    %57 = arith.addf %54, %56 : vector<24x128xf32>
    %cst_20 = arith.constant 0.00692964625 : f32
    %58 = vector.broadcast %cst_20 : f32 to vector<24x128xf32>
    %59 = arith.mulf %58, %42 : vector<24x128xf32>
    %60 = arith.addf %57, %59 : vector<24x128xf32>
    %cst_21 = arith.constant 0.00443674857 : f32
    %61 = vector.broadcast %cst_21 : f32 to vector<24x128xf32>
    %62 = arith.addf %60, %61 : vector<24x128xf32>
    %cst_22 = arith.constant -0.0104651805 : f32
    %63 = vector.broadcast %cst_22 : f32 to vector<24x128xf32>
    %64 = arith.mulf %63, %47 : vector<24x128xf32>
    %cst_23 = arith.constant -0.0205768067 : f32
    %65 = vector.broadcast %cst_23 : f32 to vector<24x128xf32>
    %66 = arith.mulf %65, %1 : vector<24x128xf32>
    %67 = arith.addf %64, %66 : vector<24x128xf32>
    %cst_24 = arith.constant 0.0310419872 : f32
    %68 = vector.broadcast %cst_24 : f32 to vector<24x128xf32>
    %69 = arith.mulf %68, %37 : vector<24x128xf32>
    %70 = arith.addf %67, %69 : vector<24x128xf32>
    %cst_25 = arith.constant 0.0354939885 : f32
    %71 = vector.broadcast %cst_25 : f32 to vector<24x128xf32>
    %72 = arith.addf %70, %71 : vector<24x128xf32>
    %cst_26 = arith.constant 0.0310419872 : f32
    %73 = vector.broadcast %cst_26 : f32 to vector<24x128xf32>
    %74 = arith.mulf %73, %52 : vector<24x128xf32>
    %cst_27 = arith.constant -0.026021529 : f32
    %75 = vector.broadcast %cst_27 : f32 to vector<24x128xf32>
    %76 = arith.mulf %75, %47 : vector<24x128xf32>
    %77 = arith.addf %74, %76 : vector<24x128xf32>
    %cst_28 = arith.constant -0.00502045825 : f32
    %78 = vector.broadcast %cst_28 : f32 to vector<24x128xf32>
    %79 = arith.mulf %78, %1 : vector<24x128xf32>
    %80 = arith.addf %77, %79 : vector<24x128xf32>
    %cst_29 = arith.constant 0.0354939885 : f32
    %81 = vector.broadcast %cst_29 : f32 to vector<24x128xf32>
    %82 = arith.addf %80, %81 : vector<24x128xf32>
    %83 = arith.select %32, %72, %82 : vector<24x128xi1>, vector<24x128xf32>
    %84 = arith.select %30, %62, %83 : vector<24x128xi1>, vector<24x128xf32>
    %85 = arith.subf %3, %1 : vector<24x128xf32>
    %86 = arith.mulf %85, %85 : vector<24x128xf32>
    %87 = vector.shape_cast %86 : vector<24x128xf32> to vector<1x24x128xf32>
    %cst_30 = arith.constant dense<0.000000e+00> : vector<1xf32>
    %88 = vector.multi_reduction <add>, %87, %cst_30 [1, 2] : vector<1x24x128xf32> to vector<1xf32>
    %89 = vector.shape_cast %88 : vector<1xf32> to vector<1x1x1xf32>
    %90 = vector.extract %89[0, 0, 0] : f32 from vector<1x1x1xf32>
    %cst_31 = arith.constant 2.44140625E-4 : f32
    %91 = arith.mulf %cst_31, %90 : f32
    %92 = tpu.iota {dimensions = array<i32: 0>} : vector<8x128xi32>
    %93 = tpu.iota {dimensions = array<i32: 1>} : vector<8x128xi32>
    %c128_i32 = arith.constant 128 : i32
    %94 = vector.broadcast %c128_i32 : i32 to vector<8x128xi32>
    %95 = arith.muli %92, %94 : vector<8x128xi32>
    %96 = arith.addi %95, %93 : vector<8x128xi32>
    %97 = arith.sitofp %96 : vector<8x128xi32> to vector<8x128xf32>
    %cst_32 = arith.constant 3.125000e-02 : f32
    %98 = vector.broadcast %cst_32 : f32 to vector<8x128xf32>
    %99 = arith.mulf %97, %98 : vector<8x128xf32>
    %100 = math.floor %99 : vector<8x128xf32>
    %101 = arith.fptosi %100 : vector<8x128xf32> to vector<8x128xi32>
    %c32_i32 = arith.constant 32 : i32
    %102 = vector.broadcast %c32_i32 : i32 to vector<8x128xi32>
    %103 = arith.muli %101, %102 : vector<8x128xi32>
    %104 = arith.subi %96, %103 : vector<8x128xi32>
    %c32_i32_33 = arith.constant 32 : i32
    %105 = vector.broadcast %c32_i32_33 : i32 to vector<8x128xi32>
    %106 = arith.cmpi sge, %104, %105 : vector<8x128xi32>
    %107 = arith.extui %106 : vector<8x128xi1> to vector<8x128xi32>
    %c0_i32_34 = arith.constant 0 : i32
    %108 = vector.broadcast %c0_i32_34 : i32 to vector<8x128xi32>
    %109 = arith.cmpi slt, %104, %108 : vector<8x128xi32>
    %110 = arith.extui %109 : vector<8x128xi1> to vector<8x128xi32>
    %111 = arith.addi %101, %107 : vector<8x128xi32>
    %112 = arith.subi %111, %110 : vector<8x128xi32>
    %c32_i32_35 = arith.constant 32 : i32
    %113 = vector.broadcast %c32_i32_35 : i32 to vector<8x128xi32>
    %114 = arith.muli %113, %107 : vector<8x128xi32>
    %115 = arith.subi %104, %114 : vector<8x128xi32>
    %c32_i32_36 = arith.constant 32 : i32
    %116 = vector.broadcast %c32_i32_36 : i32 to vector<8x128xi32>
    %117 = arith.muli %116, %110 : vector<8x128xi32>
    %118 = arith.addi %115, %117 : vector<8x128xi32>
    %c2_i32_37 = arith.constant 2 : i32
    %119 = vector.broadcast %c2_i32_37 : i32 to vector<8x128xi32>
    %120 = arith.cmpi sge, %112, %119 : vector<8x128xi32>
    %c32_i32_38 = arith.constant 32 : i32
    %121 = vector.broadcast %c32_i32_38 : i32 to vector<8x128xi32>
    %122 = arith.cmpi slt, %112, %121 : vector<8x128xi32>
    %123 = arith.andi %120, %122 : vector<8x128xi1>
    %c1_i32_39 = arith.constant 1 : i32
    %124 = vector.broadcast %c1_i32_39 : i32 to vector<8x128xi32>
    %125 = arith.cmpi sge, %112, %124 : vector<8x128xi32>
    %c32_i32_40 = arith.constant 32 : i32
    %126 = vector.broadcast %c32_i32_40 : i32 to vector<8x128xi32>
    %127 = arith.cmpi slt, %112, %126 : vector<8x128xi32>
    %128 = arith.andi %125, %127 : vector<8x128xi1>
    %c0_i32_41 = arith.constant 0 : i32
    %129 = vector.broadcast %c0_i32_41 : i32 to vector<8x128xi32>
    %130 = arith.cmpi sge, %112, %129 : vector<8x128xi32>
    %c32_i32_42 = arith.constant 32 : i32
    %131 = vector.broadcast %c32_i32_42 : i32 to vector<8x128xi32>
    %132 = arith.cmpi slt, %112, %131 : vector<8x128xi32>
    %133 = arith.andi %130, %132 : vector<8x128xi1>
    %c0_i32_43 = arith.constant 0 : i32
    %134 = vector.broadcast %c0_i32_43 : i32 to vector<8x128xi32>
    %135 = arith.cmpi sge, %112, %134 : vector<8x128xi32>
    %c31_i32 = arith.constant 31 : i32
    %136 = vector.broadcast %c31_i32 : i32 to vector<8x128xi32>
    %137 = arith.cmpi slt, %112, %136 : vector<8x128xi32>
    %138 = arith.andi %135, %137 : vector<8x128xi1>
    %c0_i32_44 = arith.constant 0 : i32
    %139 = vector.broadcast %c0_i32_44 : i32 to vector<8x128xi32>
    %140 = arith.cmpi sge, %112, %139 : vector<8x128xi32>
    %c30_i32 = arith.constant 30 : i32
    %141 = vector.broadcast %c30_i32 : i32 to vector<8x128xi32>
    %142 = arith.cmpi slt, %112, %141 : vector<8x128xi32>
    %143 = arith.andi %140, %142 : vector<8x128xi1>
    %c2_i32_45 = arith.constant 2 : i32
    %144 = vector.broadcast %c2_i32_45 : i32 to vector<8x128xi32>
    %145 = arith.cmpi sge, %118, %144 : vector<8x128xi32>
    %c32_i32_46 = arith.constant 32 : i32
    %146 = vector.broadcast %c32_i32_46 : i32 to vector<8x128xi32>
    %147 = arith.cmpi slt, %118, %146 : vector<8x128xi32>
    %148 = arith.andi %145, %147 : vector<8x128xi1>
    %c1_i32_47 = arith.constant 1 : i32
    %149 = vector.broadcast %c1_i32_47 : i32 to vector<8x128xi32>
    %150 = arith.cmpi sge, %118, %149 : vector<8x128xi32>
    %c32_i32_48 = arith.constant 32 : i32
    %151 = vector.broadcast %c32_i32_48 : i32 to vector<8x128xi32>
    %152 = arith.cmpi slt, %118, %151 : vector<8x128xi32>
    %153 = arith.andi %150, %152 : vector<8x128xi1>
    %c0_i32_49 = arith.constant 0 : i32
    %154 = vector.broadcast %c0_i32_49 : i32 to vector<8x128xi32>
    %155 = arith.cmpi sge, %118, %154 : vector<8x128xi32>
    %c32_i32_50 = arith.constant 32 : i32
    %156 = vector.broadcast %c32_i32_50 : i32 to vector<8x128xi32>
    %157 = arith.cmpi slt, %118, %156 : vector<8x128xi32>
    %158 = arith.andi %155, %157 : vector<8x128xi1>
    %c0_i32_51 = arith.constant 0 : i32
    %159 = vector.broadcast %c0_i32_51 : i32 to vector<8x128xi32>
    %160 = arith.cmpi sge, %118, %159 : vector<8x128xi32>
    %c31_i32_52 = arith.constant 31 : i32
    %161 = vector.broadcast %c31_i32_52 : i32 to vector<8x128xi32>
    %162 = arith.cmpi slt, %118, %161 : vector<8x128xi32>
    %163 = arith.andi %160, %162 : vector<8x128xi1>
    %c0_i32_53 = arith.constant 0 : i32
    %164 = vector.broadcast %c0_i32_53 : i32 to vector<8x128xi32>
    %165 = arith.cmpi sge, %118, %164 : vector<8x128xi32>
    %c30_i32_54 = arith.constant 30 : i32
    %166 = vector.broadcast %c30_i32_54 : i32 to vector<8x128xi32>
    %167 = arith.cmpi slt, %118, %166 : vector<8x128xi32>
    %168 = arith.andi %165, %167 : vector<8x128xi1>
    %cst_55 = arith.constant 0.000000e+00 : f32
    %169 = vector.broadcast %cst_55 : f32 to vector<8x128xf32>
    %cst_56 = arith.constant 0.000000e+00 : f32
    %170 = vector.broadcast %cst_56 : f32 to vector<8x128xf32>
    %cst_57 = arith.constant 0.000000e+00 : f32
    %171 = vector.broadcast %cst_57 : f32 to vector<8x128xf32>
    %cst_58 = arith.constant 0.000000e+00 : f32
    %172 = vector.broadcast %cst_58 : f32 to vector<8x128xf32>
    %c96_i32 = arith.constant 96 : i32
    %173 = tpu.dynamic_rotate %84 by %c96_i32 dim 1 : vector<24x128xf32>, i32 -> vector<24x128xf32>
    %c23_i32_59 = arith.constant 23 : i32
    %174 = tpu.dynamic_rotate %173 by %c23_i32_59 dim 0 : vector<24x128xf32>, i32 -> vector<24x128xf32>
    %c96_i32_60 = arith.constant 96 : i32
    %175 = vector.broadcast %c96_i32_60 : i32 to vector<24x128xi32>
    %176 = arith.cmpi slt, %5, %175 : vector<24x128xi32>
    %177 = arith.select %176, %173, %174 : vector<24x128xi1>, vector<24x128xf32>
    %178 = arith.subf %177, %84 : vector<24x128xf32>
    %c96_i32_61 = arith.constant 96 : i32
    %179 = tpu.dynamic_rotate %3 by %c96_i32_61 dim 1 : vector<24x128xf32>, i32 -> vector<24x128xf32>
    %c23_i32_62 = arith.constant 23 : i32
    %180 = tpu.dynamic_rotate %179 by %c23_i32_62 dim 0 : vector<24x128xf32>, i32 -> vector<24x128xf32>
    %181 = arith.select %176, %179, %180 : vector<24x128xi1>, vector<24x128xf32>
    %182 = arith.subf %181, %3 : vector<24x128xf32>
    %183 = arith.mulf %178, %178 : vector<24x128xf32>
    %184 = math.absf %182 : vector<24x128xf32>
    %185 = vector.extract_strided_slice %183 {offsets = [0, 0], sizes = [8, 128], strides = [1, 1]} : vector<24x128xf32> to vector<8x128xf32>
    %186 = vector.extract_strided_slice %183 {offsets = [8, 0], sizes = [8, 128], strides = [1, 1]} : vector<24x128xf32> to vector<8x128xf32>
    %187 = arith.addf %185, %186 : vector<8x128xf32>
    %188 = vector.extract_strided_slice %183 {offsets = [16, 0], sizes = [8, 128], strides = [1, 1]} : vector<24x128xf32> to vector<8x128xf32>
    %189 = arith.addf %187, %188 : vector<8x128xf32>
    %190 = vector.extract_strided_slice %184 {offsets = [0, 0], sizes = [8, 128], strides = [1, 1]} : vector<24x128xf32> to vector<8x128xf32>
    %191 = vector.extract_strided_slice %184 {offsets = [8, 0], sizes = [8, 128], strides = [1, 1]} : vector<24x128xf32> to vector<8x128xf32>
    %192 = arith.addf %190, %191 : vector<8x128xf32>
    %193 = vector.extract_strided_slice %184 {offsets = [16, 0], sizes = [8, 128], strides = [1, 1]} : vector<24x128xf32> to vector<8x128xf32>
    %194 = arith.addf %192, %193 : vector<8x128xf32>
    %cst_63 = arith.constant -6.89972305 : f32
    %195 = vector.broadcast %cst_63 : f32 to vector<8x128xf32>
    %196 = arith.subf %195, %189 : vector<8x128xf32>
    %197 = math.exp %196 : vector<8x128xf32>
    %198 = arith.mulf %197, %194 : vector<8x128xf32>
    %199 = arith.andi %138, %158 : vector<8x128xi1>
    %cst_64 = arith.constant 0.000000e+00 : f32
    %200 = vector.broadcast %cst_64 : f32 to vector<8x128xf32>
    %201 = arith.select %199, %198, %200 : vector<8x128xi1>, vector<8x128xf32>
    %202 = arith.addf %169, %201 : vector<8x128xf32>
    %c127_i32_65 = arith.constant 127 : i32
    %203 = tpu.dynamic_rotate %84 by %c127_i32_65 dim 1 : vector<24x128xf32>, i32 -> vector<24x128xf32>
    %c23_i32_66 = arith.constant 23 : i32
    %204 = tpu.dynamic_rotate %203 by %c23_i32_66 dim 0 : vector<24x128xf32>, i32 -> vector<24x128xf32>
    %205 = arith.select %36, %203, %204 : vector<24x128xi1>, vector<24x128xf32>
    %206 = arith.subf %205, %84 : vector<24x128xf32>
    %c127_i32_67 = arith.constant 127 : i32
    %207 = tpu.dynamic_rotate %3 by %c127_i32_67 dim 1 : vector<24x128xf32>, i32 -> vector<24x128xf32>
    %c23_i32_68 = arith.constant 23 : i32
    %208 = tpu.dynamic_rotate %207 by %c23_i32_68 dim 0 : vector<24x128xf32>, i32 -> vector<24x128xf32>
    %209 = arith.select %36, %207, %208 : vector<24x128xi1>, vector<24x128xf32>
    %210 = arith.subf %209, %3 : vector<24x128xf32>
    %211 = arith.mulf %206, %206 : vector<24x128xf32>
    %212 = math.absf %210 : vector<24x128xf32>
    %213 = vector.extract_strided_slice %211 {offsets = [0, 0], sizes = [8, 128], strides = [1, 1]} : vector<24x128xf32> to vector<8x128xf32>
    %214 = vector.extract_strided_slice %211 {offsets = [8, 0], sizes = [8, 128], strides = [1, 1]} : vector<24x128xf32> to vector<8x128xf32>
    %215 = arith.addf %213, %214 : vector<8x128xf32>
    %216 = vector.extract_strided_slice %211 {offsets = [16, 0], sizes = [8, 128], strides = [1, 1]} : vector<24x128xf32> to vector<8x128xf32>
    %217 = arith.addf %215, %216 : vector<8x128xf32>
    %218 = vector.extract_strided_slice %212 {offsets = [0, 0], sizes = [8, 128], strides = [1, 1]} : vector<24x128xf32> to vector<8x128xf32>
    %219 = vector.extract_strided_slice %212 {offsets = [8, 0], sizes = [8, 128], strides = [1, 1]} : vector<24x128xf32> to vector<8x128xf32>
    %220 = arith.addf %218, %219 : vector<8x128xf32>
    %221 = vector.extract_strided_slice %212 {offsets = [16, 0], sizes = [8, 128], strides = [1, 1]} : vector<24x128xf32> to vector<8x128xf32>
    %222 = arith.addf %220, %221 : vector<8x128xf32>
    %cst_69 = arith.constant -6.89972305 : f32
    %223 = vector.broadcast %cst_69 : f32 to vector<8x128xf32>
    %224 = arith.subf %223, %217 : vector<8x128xf32>
    %225 = math.exp %224 : vector<8x128xf32>
    %226 = arith.mulf %225, %222 : vector<8x128xf32>
    %227 = arith.andi %133, %163 : vector<8x128xi1>
    %cst_70 = arith.constant 0.000000e+00 : f32
    %228 = vector.broadcast %cst_70 : f32 to vector<8x128xf32>
    %229 = arith.select %227, %226, %228 : vector<8x128xi1>, vector<8x128xf32>
    %230 = arith.addf %170, %229 : vector<8x128xf32>
    %c33_i32 = arith.constant 33 : i32
    %231 = tpu.dynamic_rotate %84 by %c33_i32 dim 1 : vector<24x128xf32>, i32 -> vector<24x128xf32>
    %c1_i32_71 = arith.constant 1 : i32
    %232 = tpu.dynamic_rotate %231 by %c1_i32_71 dim 0 : vector<24x128xf32>, i32 -> vector<24x128xf32>
    %c33_i32_72 = arith.constant 33 : i32
    %233 = vector.broadcast %c33_i32_72 : i32 to vector<24x128xi32>
    %234 = arith.cmpi slt, %5, %233 : vector<24x128xi32>
    %235 = arith.select %234, %232, %231 : vector<24x128xi1>, vector<24x128xf32>
    %236 = arith.subf %235, %84 : vector<24x128xf32>
    %c33_i32_73 = arith.constant 33 : i32
    %237 = tpu.dynamic_rotate %3 by %c33_i32_73 dim 1 : vector<24x128xf32>, i32 -> vector<24x128xf32>
    %c1_i32_74 = arith.constant 1 : i32
    %238 = tpu.dynamic_rotate %237 by %c1_i32_74 dim 0 : vector<24x128xf32>, i32 -> vector<24x128xf32>
    %239 = arith.select %234, %238, %237 : vector<24x128xi1>, vector<24x128xf32>
    %240 = arith.subf %239, %3 : vector<24x128xf32>
    %241 = arith.mulf %236, %236 : vector<24x128xf32>
    %242 = math.absf %240 : vector<24x128xf32>
    %243 = vector.extract_strided_slice %241 {offsets = [0, 0], sizes = [8, 128], strides = [1, 1]} : vector<24x128xf32> to vector<8x128xf32>
    %244 = vector.extract_strided_slice %241 {offsets = [8, 0], sizes = [8, 128], strides = [1, 1]} : vector<24x128xf32> to vector<8x128xf32>
    %245 = arith.addf %243, %244 : vector<8x128xf32>
    %246 = vector.extract_strided_slice %241 {offsets = [16, 0], sizes = [8, 128], strides = [1, 1]} : vector<24x128xf32> to vector<8x128xf32>
    %247 = arith.addf %245, %246 : vector<8x128xf32>
    %248 = vector.extract_strided_slice %242 {offsets = [0, 0], sizes = [8, 128], strides = [1, 1]} : vector<24x128xf32> to vector<8x128xf32>
    %249 = vector.extract_strided_slice %242 {offsets = [8, 0], sizes = [8, 128], strides = [1, 1]} : vector<24x128xf32> to vector<8x128xf32>
    %250 = arith.addf %248, %249 : vector<8x128xf32>
    %251 = vector.extract_strided_slice %242 {offsets = [16, 0], sizes = [8, 128], strides = [1, 1]} : vector<24x128xf32> to vector<8x128xf32>
    %252 = arith.addf %250, %251 : vector<8x128xf32>
    %cst_75 = arith.constant -6.86797428 : f32
    %253 = vector.broadcast %cst_75 : f32 to vector<8x128xf32>
    %254 = arith.subf %253, %247 : vector<8x128xf32>
    %255 = math.exp %254 : vector<8x128xf32>
    %256 = arith.mulf %255, %252 : vector<8x128xf32>
    %257 = arith.andi %128, %153 : vector<8x128xi1>
    %cst_76 = arith.constant 0.000000e+00 : f32
    %258 = vector.broadcast %cst_76 : f32 to vector<8x128xf32>
    %259 = arith.select %257, %256, %258 : vector<8x128xi1>, vector<8x128xf32>
    %260 = arith.addf %171, %259 : vector<8x128xf32>
    %c97_i32 = arith.constant 97 : i32
    %261 = tpu.dynamic_rotate %84 by %c97_i32 dim 1 : vector<24x128xf32>, i32 -> vector<24x128xf32>
    %c23_i32_77 = arith.constant 23 : i32
    %262 = tpu.dynamic_rotate %261 by %c23_i32_77 dim 0 : vector<24x128xf32>, i32 -> vector<24x128xf32>
    %c97_i32_78 = arith.constant 97 : i32
    %263 = vector.broadcast %c97_i32_78 : i32 to vector<24x128xi32>
    %264 = arith.cmpi slt, %5, %263 : vector<24x128xi32>
    %265 = arith.select %264, %261, %262 : vector<24x128xi1>, vector<24x128xf32>
    %266 = arith.subf %265, %84 : vector<24x128xf32>
    %c97_i32_79 = arith.constant 97 : i32
    %267 = tpu.dynamic_rotate %3 by %c97_i32_79 dim 1 : vector<24x128xf32>, i32 -> vector<24x128xf32>
    %c23_i32_80 = arith.constant 23 : i32
    %268 = tpu.dynamic_rotate %267 by %c23_i32_80 dim 0 : vector<24x128xf32>, i32 -> vector<24x128xf32>
    %269 = arith.select %264, %267, %268 : vector<24x128xi1>, vector<24x128xf32>
    %270 = arith.subf %269, %3 : vector<24x128xf32>
    %271 = arith.mulf %266, %266 : vector<24x128xf32>
    %272 = math.absf %270 : vector<24x128xf32>
    %273 = vector.extract_strided_slice %271 {offsets = [0, 0], sizes = [8, 128], strides = [1, 1]} : vector<24x128xf32> to vector<8x128xf32>
    %274 = vector.extract_strided_slice %271 {offsets = [8, 0], sizes = [8, 128], strides = [1, 1]} : vector<24x128xf32> to vector<8x128xf32>
    %275 = arith.addf %273, %274 : vector<8x128xf32>
    %276 = vector.extract_strided_slice %271 {offsets = [16, 0], sizes = [8, 128], strides = [1, 1]} : vector<24x128xf32> to vector<8x128xf32>
    %277 = arith.addf %275, %276 : vector<8x128xf32>
    %278 = vector.extract_strided_slice %272 {offsets = [0, 0], sizes = [8, 128], strides = [1, 1]} : vector<24x128xf32> to vector<8x128xf32>
    %279 = vector.extract_strided_slice %272 {offsets = [8, 0], sizes = [8, 128], strides = [1, 1]} : vector<24x128xf32> to vector<8x128xf32>
    %280 = arith.addf %278, %279 : vector<8x128xf32>
    %281 = vector.extract_strided_slice %272 {offsets = [16, 0], sizes = [8, 128], strides = [1, 1]} : vector<24x128xf32> to vector<8x128xf32>
    %282 = arith.addf %280, %281 : vector<8x128xf32>
    %cst_81 = arith.constant -6.86797428 : f32
    %283 = vector.broadcast %cst_81 : f32 to vector<8x128xf32>
    %284 = arith.subf %283, %277 : vector<8x128xf32>
    %285 = math.exp %284 : vector<8x128xf32>
    %286 = arith.mulf %285, %282 : vector<8x128xf32>
    %287 = arith.andi %138, %153 : vector<8x128xi1>
    %cst_82 = arith.constant 0.000000e+00 : f32
    %288 = vector.broadcast %cst_82 : f32 to vector<8x128xf32>
    %289 = arith.select %287, %286, %288 : vector<8x128xi1>, vector<8x128xf32>
    %290 = arith.addf %172, %289 : vector<8x128xf32>
    %c64_i32 = arith.constant 64 : i32
    %291 = tpu.dynamic_rotate %84 by %c64_i32 dim 1 : vector<24x128xf32>, i32 -> vector<24x128xf32>
    %c23_i32_83 = arith.constant 23 : i32
    %292 = tpu.dynamic_rotate %291 by %c23_i32_83 dim 0 : vector<24x128xf32>, i32 -> vector<24x128xf32>
    %c64_i32_84 = arith.constant 64 : i32
    %293 = vector.broadcast %c64_i32_84 : i32 to vector<24x128xi32>
    %294 = arith.cmpi slt, %5, %293 : vector<24x128xi32>
    %295 = arith.select %294, %291, %292 : vector<24x128xi1>, vector<24x128xf32>
    %296 = arith.subf %295, %84 : vector<24x128xf32>
    %c64_i32_85 = arith.constant 64 : i32
    %297 = tpu.dynamic_rotate %3 by %c64_i32_85 dim 1 : vector<24x128xf32>, i32 -> vector<24x128xf32>
    %c23_i32_86 = arith.constant 23 : i32
    %298 = tpu.dynamic_rotate %297 by %c23_i32_86 dim 0 : vector<24x128xf32>, i32 -> vector<24x128xf32>
    %299 = arith.select %294, %297, %298 : vector<24x128xi1>, vector<24x128xf32>
    %300 = arith.subf %299, %3 : vector<24x128xf32>
    %301 = arith.mulf %296, %296 : vector<24x128xf32>
    %302 = math.absf %300 : vector<24x128xf32>
    %303 = vector.extract_strided_slice %301 {offsets = [0, 0], sizes = [8, 128], strides = [1, 1]} : vector<24x128xf32> to vector<8x128xf32>
    %304 = vector.extract_strided_slice %301 {offsets = [8, 0], sizes = [8, 128], strides = [1, 1]} : vector<24x128xf32> to vector<8x128xf32>
    %305 = arith.addf %303, %304 : vector<8x128xf32>
    %306 = vector.extract_strided_slice %301 {offsets = [16, 0], sizes = [8, 128], strides = [1, 1]} : vector<24x128xf32> to vector<8x128xf32>
    %307 = arith.addf %305, %306 : vector<8x128xf32>
    %308 = vector.extract_strided_slice %302 {offsets = [0, 0], sizes = [8, 128], strides = [1, 1]} : vector<24x128xf32> to vector<8x128xf32>
    %309 = vector.extract_strided_slice %302 {offsets = [8, 0], sizes = [8, 128], strides = [1, 1]} : vector<24x128xf32> to vector<8x128xf32>
    %310 = arith.addf %308, %309 : vector<8x128xf32>
    %311 = vector.extract_strided_slice %302 {offsets = [16, 0], sizes = [8, 128], strides = [1, 1]} : vector<24x128xf32> to vector<8x128xf32>
    %312 = arith.addf %310, %311 : vector<8x128xf32>
    %cst_87 = arith.constant -6.86693335 : f32
    %313 = vector.broadcast %cst_87 : f32 to vector<8x128xf32>
    %314 = arith.subf %313, %307 : vector<8x128xf32>
    %315 = math.exp %314 : vector<8x128xf32>
    %316 = arith.mulf %315, %312 : vector<8x128xf32>
    %317 = arith.andi %143, %158 : vector<8x128xi1>
    %cst_88 = arith.constant 0.000000e+00 : f32
    %318 = vector.broadcast %cst_88 : f32 to vector<8x128xf32>
    %319 = arith.select %317, %316, %318 : vector<8x128xi1>, vector<8x128xf32>
    %320 = arith.addf %202, %319 : vector<8x128xf32>
    %c126_i32_89 = arith.constant 126 : i32
    %321 = tpu.dynamic_rotate %84 by %c126_i32_89 dim 1 : vector<24x128xf32>, i32 -> vector<24x128xf32>
    %c23_i32_90 = arith.constant 23 : i32
    %322 = tpu.dynamic_rotate %321 by %c23_i32_90 dim 0 : vector<24x128xf32>, i32 -> vector<24x128xf32>
    %323 = arith.select %41, %321, %322 : vector<24x128xi1>, vector<24x128xf32>
    %324 = arith.subf %323, %84 : vector<24x128xf32>
    %c126_i32_91 = arith.constant 126 : i32
    %325 = tpu.dynamic_rotate %3 by %c126_i32_91 dim 1 : vector<24x128xf32>, i32 -> vector<24x128xf32>
    %c23_i32_92 = arith.constant 23 : i32
    %326 = tpu.dynamic_rotate %325 by %c23_i32_92 dim 0 : vector<24x128xf32>, i32 -> vector<24x128xf32>
    %327 = arith.select %41, %325, %326 : vector<24x128xi1>, vector<24x128xf32>
    %328 = arith.subf %327, %3 : vector<24x128xf32>
    %329 = arith.mulf %324, %324 : vector<24x128xf32>
    %330 = math.absf %328 : vector<24x128xf32>
    %331 = vector.extract_strided_slice %329 {offsets = [0, 0], sizes = [8, 128], strides = [1, 1]} : vector<24x128xf32> to vector<8x128xf32>
    %332 = vector.extract_strided_slice %329 {offsets = [8, 0], sizes = [8, 128], strides = [1, 1]} : vector<24x128xf32> to vector<8x128xf32>
    %333 = arith.addf %331, %332 : vector<8x128xf32>
    %334 = vector.extract_strided_slice %329 {offsets = [16, 0], sizes = [8, 128], strides = [1, 1]} : vector<24x128xf32> to vector<8x128xf32>
    %335 = arith.addf %333, %334 : vector<8x128xf32>
    %336 = vector.extract_strided_slice %330 {offsets = [0, 0], sizes = [8, 128], strides = [1, 1]} : vector<24x128xf32> to vector<8x128xf32>
    %337 = vector.extract_strided_slice %330 {offsets = [8, 0], sizes = [8, 128], strides = [1, 1]} : vector<24x128xf32> to vector<8x128xf32>
    %338 = arith.addf %336, %337 : vector<8x128xf32>
    %339 = vector.extract_strided_slice %330 {offsets = [16, 0], sizes = [8, 128], strides = [1, 1]} : vector<24x128xf32> to vector<8x128xf32>
    %340 = arith.addf %338, %339 : vector<8x128xf32>
    %cst_93 = arith.constant -6.86693335 : f32
    %341 = vector.broadcast %cst_93 : f32 to vector<8x128xf32>
    %342 = arith.subf %341, %335 : vector<8x128xf32>
    %343 = math.exp %342 : vector<8x128xf32>
    %344 = arith.mulf %343, %340 : vector<8x128xf32>
    %345 = arith.andi %133, %168 : vector<8x128xi1>
    %cst_94 = arith.constant 0.000000e+00 : f32
    %346 = vector.broadcast %cst_94 : f32 to vector<8x128xf32>
    %347 = arith.select %345, %344, %346 : vector<8x128xi1>, vector<8x128xf32>
    %348 = arith.addf %230, %347 : vector<8x128xf32>
    %c65_i32 = arith.constant 65 : i32
    %349 = tpu.dynamic_rotate %84 by %c65_i32 dim 1 : vector<24x128xf32>, i32 -> vector<24x128xf32>
    %c1_i32_95 = arith.constant 1 : i32
    %350 = tpu.dynamic_rotate %349 by %c1_i32_95 dim 0 : vector<24x128xf32>, i32 -> vector<24x128xf32>
    %c65_i32_96 = arith.constant 65 : i32
    %351 = vector.broadcast %c65_i32_96 : i32 to vector<24x128xi32>
    %352 = arith.cmpi slt, %5, %351 : vector<24x128xi32>
    %353 = arith.select %352, %350, %349 : vector<24x128xi1>, vector<24x128xf32>
    %354 = arith.subf %353, %84 : vector<24x128xf32>
    %c65_i32_97 = arith.constant 65 : i32
    %355 = tpu.dynamic_rotate %3 by %c65_i32_97 dim 1 : vector<24x128xf32>, i32 -> vector<24x128xf32>
    %c1_i32_98 = arith.constant 1 : i32
    %356 = tpu.dynamic_rotate %355 by %c1_i32_98 dim 0 : vector<24x128xf32>, i32 -> vector<24x128xf32>
    %357 = arith.select %352, %356, %355 : vector<24x128xi1>, vector<24x128xf32>
    %358 = arith.subf %357, %3 : vector<24x128xf32>
    %359 = arith.mulf %354, %354 : vector<24x128xf32>
    %360 = math.absf %358 : vector<24x128xf32>
    %361 = vector.extract_strided_slice %359 {offsets = [0, 0], sizes = [8, 128], strides = [1, 1]} : vector<24x128xf32> to vector<8x128xf32>
    %362 = vector.extract_strided_slice %359 {offsets = [8, 0], sizes = [8, 128], strides = [1, 1]} : vector<24x128xf32> to vector<8x128xf32>
    %363 = arith.addf %361, %362 : vector<8x128xf32>
    %364 = vector.extract_strided_slice %359 {offsets = [16, 0], sizes = [8, 128], strides = [1, 1]} : vector<24x128xf32> to vector<8x128xf32>
    %365 = arith.addf %363, %364 : vector<8x128xf32>
    %366 = vector.extract_strided_slice %360 {offsets = [0, 0], sizes = [8, 128], strides = [1, 1]} : vector<24x128xf32> to vector<8x128xf32>
    %367 = vector.extract_strided_slice %360 {offsets = [8, 0], sizes = [8, 128], strides = [1, 1]} : vector<24x128xf32> to vector<8x128xf32>
    %368 = arith.addf %366, %367 : vector<8x128xf32>
    %369 = vector.extract_strided_slice %360 {offsets = [16, 0], sizes = [8, 128], strides = [1, 1]} : vector<24x128xf32> to vector<8x128xf32>
    %370 = arith.addf %368, %369 : vector<8x128xf32>
    %cst_99 = arith.constant -6.83518457 : f32
    %371 = vector.broadcast %cst_99 : f32 to vector<8x128xf32>
    %372 = arith.subf %371, %365 : vector<8x128xf32>
    %373 = math.exp %372 : vector<8x128xf32>
    %374 = arith.mulf %373, %370 : vector<8x128xf32>
    %375 = arith.andi %123, %153 : vector<8x128xi1>
    %cst_100 = arith.constant 0.000000e+00 : f32
    %376 = vector.broadcast %cst_100 : f32 to vector<8x128xf32>
    %377 = arith.select %375, %374, %376 : vector<8x128xi1>, vector<8x128xf32>
    %378 = arith.addf %260, %377 : vector<8x128xf32>
    %c65_i32_101 = arith.constant 65 : i32
    %379 = tpu.dynamic_rotate %84 by %c65_i32_101 dim 1 : vector<24x128xf32>, i32 -> vector<24x128xf32>
    %c23_i32_102 = arith.constant 23 : i32
    %380 = tpu.dynamic_rotate %379 by %c23_i32_102 dim 0 : vector<24x128xf32>, i32 -> vector<24x128xf32>
    %381 = arith.select %352, %379, %380 : vector<24x128xi1>, vector<24x128xf32>
    %382 = arith.subf %381, %84 : vector<24x128xf32>
    %c65_i32_103 = arith.constant 65 : i32
    %383 = tpu.dynamic_rotate %3 by %c65_i32_103 dim 1 : vector<24x128xf32>, i32 -> vector<24x128xf32>
    %c23_i32_104 = arith.constant 23 : i32
    %384 = tpu.dynamic_rotate %383 by %c23_i32_104 dim 0 : vector<24x128xf32>, i32 -> vector<24x128xf32>
    %385 = arith.select %352, %383, %384 : vector<24x128xi1>, vector<24x128xf32>
    %386 = arith.subf %385, %3 : vector<24x128xf32>
    %387 = arith.mulf %382, %382 : vector<24x128xf32>
    %388 = math.absf %386 : vector<24x128xf32>
    %389 = vector.extract_strided_slice %387 {offsets = [0, 0], sizes = [8, 128], strides = [1, 1]} : vector<24x128xf32> to vector<8x128xf32>
    %390 = vector.extract_strided_slice %387 {offsets = [8, 0], sizes = [8, 128], strides = [1, 1]} : vector<24x128xf32> to vector<8x128xf32>
    %391 = arith.addf %389, %390 : vector<8x128xf32>
    %392 = vector.extract_strided_slice %387 {offsets = [16, 0], sizes = [8, 128], strides = [1, 1]} : vector<24x128xf32> to vector<8x128xf32>
    %393 = arith.addf %391, %392 : vector<8x128xf32>
    %394 = vector.extract_strided_slice %388 {offsets = [0, 0], sizes = [8, 128], strides = [1, 1]} : vector<24x128xf32> to vector<8x128xf32>
    %395 = vector.extract_strided_slice %388 {offsets = [8, 0], sizes = [8, 128], strides = [1, 1]} : vector<24x128xf32> to vector<8x128xf32>
    %396 = arith.addf %394, %395 : vector<8x128xf32>
    %397 = vector.extract_strided_slice %388 {offsets = [16, 0], sizes = [8, 128], strides = [1, 1]} : vector<24x128xf32> to vector<8x128xf32>
    %398 = arith.addf %396, %397 : vector<8x128xf32>
    %cst_105 = arith.constant -6.83518457 : f32
    %399 = vector.broadcast %cst_105 : f32 to vector<8x128xf32>
    %400 = arith.subf %399, %393 : vector<8x128xf32>
    %401 = math.exp %400 : vector<8x128xf32>
    %402 = arith.mulf %401, %398 : vector<8x128xf32>
    %403 = arith.andi %143, %153 : vector<8x128xi1>
    %cst_106 = arith.constant 0.000000e+00 : f32
    %404 = vector.broadcast %cst_106 : f32 to vector<8x128xf32>
    %405 = arith.select %403, %402, %404 : vector<8x128xi1>, vector<8x128xf32>
    %406 = arith.addf %290, %405 : vector<8x128xf32>
    %c34_i32 = arith.constant 34 : i32
    %407 = tpu.dynamic_rotate %84 by %c34_i32 dim 1 : vector<24x128xf32>, i32 -> vector<24x128xf32>
    %c1_i32_107 = arith.constant 1 : i32
    %408 = tpu.dynamic_rotate %407 by %c1_i32_107 dim 0 : vector<24x128xf32>, i32 -> vector<24x128xf32>
    %c34_i32_108 = arith.constant 34 : i32
    %409 = vector.broadcast %c34_i32_108 : i32 to vector<24x128xi32>
    %410 = arith.cmpi slt, %5, %409 : vector<24x128xi32>
    %411 = arith.select %410, %408, %407 : vector<24x128xi1>, vector<24x128xf32>
    %412 = arith.subf %411, %84 : vector<24x128xf32>
    %c34_i32_109 = arith.constant 34 : i32
    %413 = tpu.dynamic_rotate %3 by %c34_i32_109 dim 1 : vector<24x128xf32>, i32 -> vector<24x128xf32>
    %c1_i32_110 = arith.constant 1 : i32
    %414 = tpu.dynamic_rotate %413 by %c1_i32_110 dim 0 : vector<24x128xf32>, i32 -> vector<24x128xf32>
    %415 = arith.select %410, %414, %413 : vector<24x128xi1>, vector<24x128xf32>
    %416 = arith.subf %415, %3 : vector<24x128xf32>
    %417 = arith.mulf %412, %412 : vector<24x128xf32>
    %418 = math.absf %416 : vector<24x128xf32>
    %419 = vector.extract_strided_slice %417 {offsets = [0, 0], sizes = [8, 128], strides = [1, 1]} : vector<24x128xf32> to vector<8x128xf32>
    %420 = vector.extract_strided_slice %417 {offsets = [8, 0], sizes = [8, 128], strides = [1, 1]} : vector<24x128xf32> to vector<8x128xf32>
    %421 = arith.addf %419, %420 : vector<8x128xf32>
    %422 = vector.extract_strided_slice %417 {offsets = [16, 0], sizes = [8, 128], strides = [1, 1]} : vector<24x128xf32> to vector<8x128xf32>
    %423 = arith.addf %421, %422 : vector<8x128xf32>
    %424 = vector.extract_strided_slice %418 {offsets = [0, 0], sizes = [8, 128], strides = [1, 1]} : vector<24x128xf32> to vector<8x128xf32>
    %425 = vector.extract_strided_slice %418 {offsets = [8, 0], sizes = [8, 128], strides = [1, 1]} : vector<24x128xf32> to vector<8x128xf32>
    %426 = arith.addf %424, %425 : vector<8x128xf32>
    %427 = vector.extract_strided_slice %418 {offsets = [16, 0], sizes = [8, 128], strides = [1, 1]} : vector<24x128xf32> to vector<8x128xf32>
    %428 = arith.addf %426, %427 : vector<8x128xf32>
    %cst_111 = arith.constant -6.83518457 : f32
    %429 = vector.broadcast %cst_111 : f32 to vector<8x128xf32>
    %430 = arith.subf %429, %423 : vector<8x128xf32>
    %431 = math.exp %430 : vector<8x128xf32>
    %432 = arith.mulf %431, %428 : vector<8x128xf32>
    %433 = arith.andi %128, %148 : vector<8x128xi1>
    %cst_112 = arith.constant 0.000000e+00 : f32
    %434 = vector.broadcast %cst_112 : f32 to vector<8x128xf32>
    %435 = arith.select %433, %432, %434 : vector<8x128xi1>, vector<8x128xf32>
    %436 = arith.addf %320, %435 : vector<8x128xf32>
    %c98_i32 = arith.constant 98 : i32
    %437 = tpu.dynamic_rotate %84 by %c98_i32 dim 1 : vector<24x128xf32>, i32 -> vector<24x128xf32>
    %c23_i32_113 = arith.constant 23 : i32
    %438 = tpu.dynamic_rotate %437 by %c23_i32_113 dim 0 : vector<24x128xf32>, i32 -> vector<24x128xf32>
    %c98_i32_114 = arith.constant 98 : i32
    %439 = vector.broadcast %c98_i32_114 : i32 to vector<24x128xi32>
    %440 = arith.cmpi slt, %5, %439 : vector<24x128xi32>
    %441 = arith.select %440, %437, %438 : vector<24x128xi1>, vector<24x128xf32>
    %442 = arith.subf %441, %84 : vector<24x128xf32>
    %c98_i32_115 = arith.constant 98 : i32
    %443 = tpu.dynamic_rotate %3 by %c98_i32_115 dim 1 : vector<24x128xf32>, i32 -> vector<24x128xf32>
    %c23_i32_116 = arith.constant 23 : i32
    %444 = tpu.dynamic_rotate %443 by %c23_i32_116 dim 0 : vector<24x128xf32>, i32 -> vector<24x128xf32>
    %445 = arith.select %440, %443, %444 : vector<24x128xi1>, vector<24x128xf32>
    %446 = arith.subf %445, %3 : vector<24x128xf32>
    %447 = arith.mulf %442, %442 : vector<24x128xf32>
    %448 = math.absf %446 : vector<24x128xf32>
    %449 = vector.extract_strided_slice %447 {offsets = [0, 0], sizes = [8, 128], strides = [1, 1]} : vector<24x128xf32> to vector<8x128xf32>
    %450 = vector.extract_strided_slice %447 {offsets = [8, 0], sizes = [8, 128], strides = [1, 1]} : vector<24x128xf32> to vector<8x128xf32>
    %451 = arith.addf %449, %450 : vector<8x128xf32>
    %452 = vector.extract_strided_slice %447 {offsets = [16, 0], sizes = [8, 128], strides = [1, 1]} : vector<24x128xf32> to vector<8x128xf32>
    %453 = arith.addf %451, %452 : vector<8x128xf32>
    %454 = vector.extract_strided_slice %448 {offsets = [0, 0], sizes = [8, 128], strides = [1, 1]} : vector<24x128xf32> to vector<8x128xf32>
    %455 = vector.extract_strided_slice %448 {offsets = [8, 0], sizes = [8, 128], strides = [1, 1]} : vector<24x128xf32> to vector<8x128xf32>
    %456 = arith.addf %454, %455 : vector<8x128xf32>
    %457 = vector.extract_strided_slice %448 {offsets = [16, 0], sizes = [8, 128], strides = [1, 1]} : vector<24x128xf32> to vector<8x128xf32>
    %458 = arith.addf %456, %457 : vector<8x128xf32>
    %cst_117 = arith.constant -6.83518457 : f32
    %459 = vector.broadcast %cst_117 : f32 to vector<8x128xf32>
    %460 = arith.subf %459, %453 : vector<8x128xf32>
    %461 = math.exp %460 : vector<8x128xf32>
    %462 = arith.mulf %461, %458 : vector<8x128xf32>
    %463 = arith.andi %138, %148 : vector<8x128xi1>
    %cst_118 = arith.constant 0.000000e+00 : f32
    %464 = vector.broadcast %cst_118 : f32 to vector<8x128xf32>
    %465 = arith.select %463, %462, %464 : vector<8x128xi1>, vector<8x128xf32>
    %466 = arith.addf %348, %465 : vector<8x128xf32>
    %c66_i32 = arith.constant 66 : i32
    %467 = tpu.dynamic_rotate %84 by %c66_i32 dim 1 : vector<24x128xf32>, i32 -> vector<24x128xf32>
    %c1_i32_119 = arith.constant 1 : i32
    %468 = tpu.dynamic_rotate %467 by %c1_i32_119 dim 0 : vector<24x128xf32>, i32 -> vector<24x128xf32>
    %c66_i32_120 = arith.constant 66 : i32
    %469 = vector.broadcast %c66_i32_120 : i32 to vector<24x128xi32>
    %470 = arith.cmpi slt, %5, %469 : vector<24x128xi32>
    %471 = arith.select %470, %468, %467 : vector<24x128xi1>, vector<24x128xf32>
    %472 = arith.subf %471, %84 : vector<24x128xf32>
    %c66_i32_121 = arith.constant 66 : i32
    %473 = tpu.dynamic_rotate %3 by %c66_i32_121 dim 1 : vector<24x128xf32>, i32 -> vector<24x128xf32>
    %c1_i32_122 = arith.constant 1 : i32
    %474 = tpu.dynamic_rotate %473 by %c1_i32_122 dim 0 : vector<24x128xf32>, i32 -> vector<24x128xf32>
    %475 = arith.select %470, %474, %473 : vector<24x128xi1>, vector<24x128xf32>
    %476 = arith.subf %475, %3 : vector<24x128xf32>
    %477 = arith.mulf %472, %472 : vector<24x128xf32>
    %478 = math.absf %476 : vector<24x128xf32>
    %479 = vector.extract_strided_slice %477 {offsets = [0, 0], sizes = [8, 128], strides = [1, 1]} : vector<24x128xf32> to vector<8x128xf32>
    %480 = vector.extract_strided_slice %477 {offsets = [8, 0], sizes = [8, 128], strides = [1, 1]} : vector<24x128xf32> to vector<8x128xf32>
    %481 = arith.addf %479, %480 : vector<8x128xf32>
    %482 = vector.extract_strided_slice %477 {offsets = [16, 0], sizes = [8, 128], strides = [1, 1]} : vector<24x128xf32> to vector<8x128xf32>
    %483 = arith.addf %481, %482 : vector<8x128xf32>
    %484 = vector.extract_strided_slice %478 {offsets = [0, 0], sizes = [8, 128], strides = [1, 1]} : vector<24x128xf32> to vector<8x128xf32>
    %485 = vector.extract_strided_slice %478 {offsets = [8, 0], sizes = [8, 128], strides = [1, 1]} : vector<24x128xf32> to vector<8x128xf32>
    %486 = arith.addf %484, %485 : vector<8x128xf32>
    %487 = vector.extract_strided_slice %478 {offsets = [16, 0], sizes = [8, 128], strides = [1, 1]} : vector<24x128xf32> to vector<8x128xf32>
    %488 = arith.addf %486, %487 : vector<8x128xf32>
    %cst_123 = arith.constant -6.80239487 : f32
    %489 = vector.broadcast %cst_123 : f32 to vector<8x128xf32>
    %490 = arith.subf %489, %483 : vector<8x128xf32>
    %491 = math.exp %490 : vector<8x128xf32>
    %492 = arith.mulf %491, %488 : vector<8x128xf32>
    %493 = arith.andi %123, %148 : vector<8x128xi1>
    %cst_124 = arith.constant 0.000000e+00 : f32
    %494 = vector.broadcast %cst_124 : f32 to vector<8x128xf32>
    %495 = arith.select %493, %492, %494 : vector<8x128xi1>, vector<8x128xf32>
    %496 = arith.addf %378, %495 : vector<8x128xf32>
    %c66_i32_125 = arith.constant 66 : i32
    %497 = tpu.dynamic_rotate %84 by %c66_i32_125 dim 1 : vector<24x128xf32>, i32 -> vector<24x128xf32>
    %c23_i32_126 = arith.constant 23 : i32
    %498 = tpu.dynamic_rotate %497 by %c23_i32_126 dim 0 : vector<24x128xf32>, i32 -> vector<24x128xf32>
    %499 = arith.select %470, %497, %498 : vector<24x128xi1>, vector<24x128xf32>
    %500 = arith.subf %499, %84 : vector<24x128xf32>
    %c66_i32_127 = arith.constant 66 : i32
    %501 = tpu.dynamic_rotate %3 by %c66_i32_127 dim 1 : vector<24x128xf32>, i32 -> vector<24x128xf32>
    %c23_i32_128 = arith.constant 23 : i32
    %502 = tpu.dynamic_rotate %501 by %c23_i32_128 dim 0 : vector<24x128xf32>, i32 -> vector<24x128xf32>
    %503 = arith.select %470, %501, %502 : vector<24x128xi1>, vector<24x128xf32>
    %504 = arith.subf %503, %3 : vector<24x128xf32>
    %505 = arith.mulf %500, %500 : vector<24x128xf32>
    %506 = math.absf %504 : vector<24x128xf32>
    %507 = vector.extract_strided_slice %505 {offsets = [0, 0], sizes = [8, 128], strides = [1, 1]} : vector<24x128xf32> to vector<8x128xf32>
    %508 = vector.extract_strided_slice %505 {offsets = [8, 0], sizes = [8, 128], strides = [1, 1]} : vector<24x128xf32> to vector<8x128xf32>
    %509 = arith.addf %507, %508 : vector<8x128xf32>
    %510 = vector.extract_strided_slice %505 {offsets = [16, 0], sizes = [8, 128], strides = [1, 1]} : vector<24x128xf32> to vector<8x128xf32>
    %511 = arith.addf %509, %510 : vector<8x128xf32>
    %512 = vector.extract_strided_slice %506 {offsets = [0, 0], sizes = [8, 128], strides = [1, 1]} : vector<24x128xf32> to vector<8x128xf32>
    %513 = vector.extract_strided_slice %506 {offsets = [8, 0], sizes = [8, 128], strides = [1, 1]} : vector<24x128xf32> to vector<8x128xf32>
    %514 = arith.addf %512, %513 : vector<8x128xf32>
    %515 = vector.extract_strided_slice %506 {offsets = [16, 0], sizes = [8, 128], strides = [1, 1]} : vector<24x128xf32> to vector<8x128xf32>
    %516 = arith.addf %514, %515 : vector<8x128xf32>
    %cst_129 = arith.constant -6.80239487 : f32
    %517 = vector.broadcast %cst_129 : f32 to vector<8x128xf32>
    %518 = arith.subf %517, %511 : vector<8x128xf32>
    %519 = math.exp %518 : vector<8x128xf32>
    %520 = arith.mulf %519, %516 : vector<8x128xf32>
    %521 = arith.andi %143, %148 : vector<8x128xi1>
    %cst_130 = arith.constant 0.000000e+00 : f32
    %522 = vector.broadcast %cst_130 : f32 to vector<8x128xf32>
    %523 = arith.select %521, %520, %522 : vector<8x128xi1>, vector<8x128xf32>
    %524 = arith.addf %406, %523 : vector<8x128xf32>
    %525 = arith.addf %436, %466 : vector<8x128xf32>
    %526 = arith.addf %496, %524 : vector<8x128xf32>
    %527 = arith.addf %525, %526 : vector<8x128xf32>
    %528 = vector.shape_cast %527 : vector<8x128xf32> to vector<1x8x128xf32>
    %cst_131 = arith.constant dense<0.000000e+00> : vector<1xf32>
    %529 = vector.multi_reduction <add>, %528, %cst_131 [1, 2] : vector<1x8x128xf32> to vector<1xf32>
    %530 = vector.shape_cast %529 : vector<1xf32> to vector<1x1x1xf32>
    %531 = vector.extract %530[0, 0, 0] : f32 from vector<1x1x1xf32>
    %532 = arith.addf %91, %531 : f32
    %533 = vector.broadcast %532 : f32 to vector<1x1x128xf32>
    %c0_132 = arith.constant 0 : index
    %c0_133 = arith.constant 0 : index
    %c0_134 = arith.constant 0 : index
    %534 = vector.load %arg3[%c0_132, %c0_133, %c0_134] : memref<1x1x128xf32, #tpu.memory_space<vmem>>, vector<1x1x128xf32>
    tpu.vector_store %arg3[%c0_132, %c0_133, %c0_134], %533 {strides = array<i32>} : memref<1x1x128xf32, #tpu.memory_space<vmem>>, vector<1x1x128xf32>,
    return
  }
  func.func @transform_0(%arg0: i32) -> (i32, i32, i32) {
    %c0_i32 = arith.constant 0 : i32
    %c0_i32_0 = arith.constant 0 : i32
    %c0_i32_1 = arith.constant 0 : i32
    return %arg0, %c0_i32, %c0_i32_0 : i32, i32, i32
  }
  func.func @transform_1(%arg0: i32) -> (i32, i32, i32) {
    %c0_i32 = arith.constant 0 : i32
    %c0_i32_0 = arith.constant 0 : i32
    %c0_i32_1 = arith.constant 0 : i32
    return %arg0, %c0_i32, %c0_i32_0 : i32, i32, i32
  }
  func.func @transform_2(%arg0: i32) -> (i32, i32, i32) {
    %c0_i32 = arith.constant 0 : i32
    %c0_i32_0 = arith.constant 0 : i32
    %c0_i32_1 = arith.constant 0 : i32
    return %arg0, %c0_i32, %c0_i32_0 : i32, i32, i32
  }
}

</mosaic_0001>

<bundles_post_ra>
// kernel: loss_function.1
= control target key start
LH: loop header
LB: loop body
LE: loop exit
PB: predicated region body
PF: predicated region fallthrough
CT: control target
= control target key end

     0   :  { %s1210_s9 = smov 0   ;;  %s2186_s0 = inlined_call_operand.vmem [shape: f32[2,24,128], index: 0, kind: input, shape index: {}]   ;;  %s2187_s1 = inlined_call_operand.vmem [shape: f32[2,24,128], index: 1, kind: input, shape index: {}]   ;;  %s2188_s2 = inlined_call_operand.vmem [shape: f32[2,1,128], index: 2, kind: output, shape index: {}]  }
   0x1 LB: > { %s1104_s10 = sadd.s32 4294967295, %s1180_s9   ;;  %p1108_p0 = scmp.ge.s32.totalorder %s1180_s9, 1  ;;  %s1180_s9 = sphi %s1210_s9, %s12_s9  }
   0x2   : > { %p122_p1 = scmp.lt.s32.totalorder %s1180_s9, 3 }
   0x4   : > { %p123_p2 = pnand %p1108_p0, %p122_p1 }
   0x5   : > { %p147_p3 = scmp.lt.s32.totalorder (!%p123_p2), %s1104_s10, 1  ;;  %s1182_s15 = smov (!%p123_p2), 1   ;;  %v166_v6 = vlaneseq (!%p123_p2)  ;;  %v1192_v38 = vmov (!%p123_p2), 0  }
   0x6   : > { %126 = sbr.rel (%p123_p2) target bundleno = 596 (0x254), region = 28  ;;  %s1183_s16 = smov (!%p123_p2), 2  }
   0x7   : > { %s1184_s17 = smov (!%p123_p2), 127   ;;  %s1185_s18 = smov (!%p123_p2), 126   ;;  %v1306_v7 = vshrl.u32 (!%p123_p2), %v166_v6, 7  ;;  %v1308_v8 = vand.u32 (!%p123_p2), 127, %v166_v6 }
   0x8   : > { %s1186_s22 = smov (!%p123_p2), 96   ;;  %s1187_s23 = smov (!%p123_p2), 33  }
   0x9   : > { %s1188_s24 = smov (!%p123_p2), 97   ;;  %s1189_s25 = smov (!%p123_p2), 64   ;;  %v172_v9 = vmul.u32 (!%p123_p2), 2, %v1306_v7  ;;  %v168_v10 = vadd.s32 (!%p123_p2), 8, %v1306_v7  ;;  %v169_v11 = vadd.s32 (!%p123_p2), 16, %v1306_v7  ;;  %vm268_vm2 = vcmp.lt.s32.totalorder (!%p123_p2), %v1306_v7, 1 }
   0xa   : > { %s1190_s26 = smov (!%p123_p2), 65   ;;  %s1191_s27 = smov (!%p123_p2), 34   ;;  %vm272_vm3 = vcmp.lt.s32.totalorder (!%p123_p2), %v1308_v8, 1  ;;  %vm288_vm6 = vcmp.lt.s32.totalorder (!%p123_p2), %v1308_v8, 2  ;;  %vm2191_vm9 = vcmp.lt.s32.totalorder (!%p123_p2), %v1306_v7, 7  ;;  %vm239_vm10 = vcmp.lt.s32.totalorder (!%p123_p2), %v1308_v8, 127 }
   0xb   : > { %v175_v12 = vadd.s32 (!%p123_p2), %v172_v9, %v1308_v8  ;;  %v173_v13 = vmul.u32 (!%p123_p2), 2, %v168_v10  ;;  %v174_v14 = vmul.u32 (!%p123_p2), 2, %v169_v11  ;;  %vm255_vm11 = vcmp.lt.s32.totalorder (!%p123_p2), %v1308_v8, 126  ;;  %s1193_s28 = smov (!%p123_p2), 98   ;;  %s1194_s29 = smov (!%p123_p2), 66  }
   0xc   : > { %vm422_vm14 = vcmp.lt.s32.totalorder (!%p123_p2), %v1308_v8, 96 }
   0xd   : > { %s2228_s10 = smov (!%p147_p3, %s1104_s10), 1  ;;  %v178_v15 = vcvt.s32.f32 %v175_v12  ;;  %v176_v16 = vadd.s32 %v173_v13, %v1308_v8  ;;  %v177_v17 = vadd.s32 %v174_v14, %v1308_v8 }
   0xe   : > { %s1113_s11 = smul.u32 24, %s2228_s10  ;;  %s159_s7 = scalar_lea.vmem %s2188_s2, %s2228_s10 }
   0xf   : > { %v181_v18 = vmul.f32 0.33333334, %v178_v15  ;;  %v179_v19 = vcvt.s32.f32 %v176_v16  ;;  %v180_v20 = vcvt.s32.f32 %v177_v17 }
  0x10   : > { %s151_s14 = scalar_lea.vmem %s2186_s0, %s1113_s11  ;;  %s1247_s21 = scalar_lea.vmem %s2187_s1, %s1113_s11 }
  0x11   : > { %v1224_v0 = vld [vmem:[%s151_s14 + $0x10] sm:$0xff]  ;;  %v1227_v1 = vld [vmem:[%s151_s14] sm:$0xff]  ;;  %v1230_v2 = vld [vmem:[%s151_s14 + $0x8] sm:$0xff]  ;;  %v184_v21 = vfloor.f32 %v181_v18  ;;  %v182_v22 = vmul.f32 0.33333334, %v179_v19 }
  0x12   : > { %263 = vrot.lane.b32.xlu1 %v1224_v0, %s1182_s15  ;;  %259 = vrot.lane.b32.xlu0 %v1227_v1, %s1182_s15  ;;  %v1252_v3 = vld [vmem:[%s1247_s21 + $0x8] sm:$0xff]  ;;  %v1257_v4 = vld [vmem:[%s1247_s21] sm:$0xff]  ;;  %v183_v23 = vmul.f32 0.33333334, %v180_v20  ;;  %v1323_v45 = vmul.f32 -0.020576807, %v1224_v0 }
  0x13   : > { %v1264_v5 = vld [vmem:[%s1247_s21 + $0x10] sm:$0xff]  ;;  %v1114_v24 = vtrunc.f32 %v184_v21  ;;  %v185_v25 = vfloor.f32 %v182_v22  ;;  %v1326_v46 = vmul.f32 -0.020576807, %v1227_v1  ;;  %v1329_v47 = vmul.f32 -0.020576807, %v1230_v2 }
  0x14   : > { %v186_v26 = vfloor.f32 %v183_v23  ;;  %v1334_v50 = vmul.f32 -0.0050204583, %v1230_v2  ;;  %v1341_v54 = vmul.f32 -0.0050204583, %v1224_v0  ;;  %v337_v57 = vmul.f32 -0.0050204583, %v1227_v1 }
  0x15   : > { %v1115_v27 = vcvt.f32.s32 %v1114_v24  ;;  %v1116_v28 = vtrunc.f32 %v185_v25  ;;  %v1352_v9 = vmul.f32 0.018172644, %v1227_v1  ;;  %v1355_v11 = vmul.f32 0.018172644, %v1224_v0 }
  0x16   : > { %276 = vrot.lane.b32.xlu1 %v1227_v1, %s1183_s16  ;;  %261 = vrot.lane.b32.xlu0 %v1230_v2, %s1182_s15  ;;  %v1118_v29 = vtrunc.f32 %v186_v26  ;;  %v1364_v20 = vmul.f32 0.018172644, %v1230_v2 }
  0x17   : > { %v190_v30 = vmul.u32 3, %v1115_v27  ;;  %v1117_v31 = vcvt.f32.s32 %v1116_v28 }
  0x18   : > { %v1119_v32 = vcvt.f32.s32 %v1118_v29 }
  0x19   : > { %v193_v33 = vsub.s32 %v175_v12, %v190_v30  ;;  %v191_v34 = vmul.u32 3, %v1117_v31 }
  0x1a   : > { %280 = vrot.lane.b32.xlu1 %v1224_v0, %s1183_s16  ;;  %278 = vrot.lane.b32.xlu0 %v1230_v2, %s1183_s16  ;;  %v192_v35 = vmul.u32 3, %v1119_v32 }
  0x1b   : > { %vm196_vm0 = vcmp.ge.s32.totalorder %v193_v33, 3  ;;  %v194_v36 = vsub.s32 %v176_v16, %v191_v34  ;;  %vm202_vm1 = vcmp.lt.s32.totalorder %v193_v33, 0 }
  0x1c   : > { %v1316_v37 = vsub.s32 %v177_v17, %v192_v35  ;;  %v199_v39 = vsel %vm196_vm0, 1, %v1192_v38  ;;  %v205_v48 = vsel %vm202_vm1, 1, %v1192_v38 }
  0x1d   : > { %vm197_vm4 = vcmp.ge.s32.totalorder %v194_v36, 3  ;;  %v208_v44 = vmul.u32 3, %v199_v39  ;;  %vm203_vm7 = vcmp.lt.s32.totalorder %v194_v36, 0  ;;  %v214_v59 = vmul.u32 3, %v205_v48 }
  0x1e   : > { %228 = vrot.lane.b32.xlu1 %v1230_v2, %s1184_s17  ;;  %226 = vrot.lane.b32.xlu0 %v1227_v1, %s1184_s17  ;;  %vm198_vm5 = vcmp.ge.s32.totalorder %v1316_v37, 3  ;;  %v200_v51 = vsel %vm197_vm4, 1, %v1192_v38  ;;  %vm204_vm8 = vcmp.lt.s32.totalorder %v1316_v37, 0  ;;  %v206_v60 = vsel %vm203_vm7, 1, %v1192_v38 }
  0x1f   : > { %v201_v55 = vsel %vm198_vm5, 1, %v1192_v38  ;;  %v211_v58 = vsub.s32 %v193_v33, %v208_v44  ;;  %v207_v61 = vsel %vm204_vm8, 1, %v1192_v38  ;;  %v209_v62 = vmul.u32 3, %v200_v51 }
  0x20   : > { %v210_v10 = vmul.u32 3, %v201_v55  ;;  %v215_v18 = vmul.u32 3, %v206_v60  ;;  %vm529_vm4 = vcmp.lt.s32.totalorder %v1308_v8, 33  ;;  %vm583_vm5 = vcmp.lt.s32.totalorder %v1308_v8, 97 }
  0x21   : > { %v1361_v17 = vadd.s32 %v214_v59, %v211_v58  ;;  %v216_v19 = vmul.u32 3, %v207_v61  ;;  %v212_v24 = vsub.s32 %v194_v36, %v209_v62  ;;  %vm744_vm7 = vcmp.lt.s32.totalorder %v1308_v8, 65 }
  0x22   : > { %243 = vrot.lane.b32.xlu1 %v1227_v1, %s1185_s18  ;;  %230 = vrot.lane.b32.xlu0 %v1224_v0, %s1184_s17 }
  0x23   : > { %vm223_vm12 = vcmp.eq.s32.totalorder %v1361_v17, 1  ;;  %vm220_vm0 = vcmp.eq.s32.totalorder %v1361_v17, 0 }
  0x26   : > { %247 = vrot.lane.b32.xlu1 %v1224_v0, %s1185_s18  ;;  %245 = vrot.lane.b32.xlu0 %v1230_v2, %s1185_s18 }
  0x2a   : > { %431 = vrot.lane.b32.xlu1 %v1252_v3, %s1186_s22  ;;  %429 = vrot.lane.b32.xlu0 %v1257_v4, %s1186_s22 }
  0x2e   : > { %482 = vrot.lane.b32.xlu1 %v1257_v4, %s1184_s17  ;;  %433 = vrot.lane.b32.xlu0 %v1264_v5, %s1186_s22 }
  0x32   : > { %486 = vrot.lane.b32.xlu1 %v1264_v5, %s1184_s17  ;;  %484 = vrot.lane.b32.xlu0 %v1252_v3, %s1184_s17 }
  0x36   : > { %538 = vrot.lane.b32.xlu1 %v1252_v3, %s1187_s23  ;;  %536 = vrot.lane.b32.xlu0 %v1257_v4, %s1187_s23 }
  0x3a   : > { %590 = vrot.lane.b32.xlu1 %v1257_v4, %s1188_s24  ;;  %540 = vrot.lane.b32.xlu0 %v1264_v5, %s1187_s23 }
  0x3e   : > { %594 = vrot.lane.b32.xlu1 %v1264_v5, %s1188_s24  ;;  %592 = vrot.lane.b32.xlu0 %v1252_v3, %s1188_s24 }
  0x42   : > { %646 = vrot.lane.b32.xlu1 %v1252_v3, %s1189_s25  ;;  %644 = vrot.lane.b32.xlu0 %v1257_v4, %s1189_s25 }
  0x46   : > { %697 = vrot.lane.b32.xlu1 %v1257_v4, %s1185_s18  ;;  %648 = vrot.lane.b32.xlu0 %v1264_v5, %s1189_s25 }
  0x4a   : > { %701 = vrot.lane.b32.xlu1 %v1264_v5, %s1185_s18  ;;  %699 = vrot.lane.b32.xlu0 %v1252_v3, %s1185_s18 }
  0x4e   : > { %753 = vrot.lane.b32.xlu1 %v1252_v3, %s1190_s26  ;;  %751 = vrot.lane.b32.xlu0 %v1257_v4, %s1190_s26 }
  0x52   : > { %846 = vrot.lane.b32.xlu1 %v1257_v4, %s1191_s27  ;;  %755 = vrot.lane.b32.xlu0 %v1264_v5, %s1190_s26 }
  0x84   : > { %v264_v40 = vpop.permute.xlu1 %263  ;;  %v260_v42 = vpop.permute.xlu0 %259 }
  0x85   : > { %v267_v41 = vrot.slane %v264_v40, 7  ;;  %v265_v43 = vrot.slane %v260_v42, 7 }
  0x87   : > { %v271_v52 = vsel %vm268_vm2, %v267_v41, %v265_v43 }
  0x88   : > { %v277_v49 = vpop.permute.xlu1 %276  ;;  %v262_v53 = vpop.permute.xlu0 %261  ;;  %v273_v63 = vsel %vm272_vm3, %v271_v52, %v260_v42 }
  0x89   : > { %v266_v56 = vrot.slane %v262_v53, 7  ;;  %v282_v12 = vrot.slane %v277_v49, 7  ;;  %v310_v21 = vmul.f32 -0.0104651805, %v273_v63  ;;  %v331_v25 = vmul.f32 -0.026021529, %v273_v63 }
  0x8b   : > { %v269_v13 = vsel %vm268_vm2, %v266_v56, %v267_v41  ;;  %v270_v14 = vsel %vm268_vm2, %v265_v43, %v266_v56  ;;  %v316_v55 = vadd.f32 %v1326_v46, %v310_v21 }
  0x8c   : > { %v281_v6 = vpop.permute.xlu1 %280  ;;  %v279_v16 = vpop.permute.xlu0 %278  ;;  %v274_v26 = vsel %vm272_vm3, %v270_v14, %v262_v53  ;;  %v275_v27 = vsel %vm272_vm3, %v269_v13, %v264_v40  ;;  %v213_v40 = vsub.s32 %v1316_v37, %v210_v10  ;;  %v1385_v53 = vadd.s32 %v215_v18, %v212_v24 }
  0x8d   : > { %v284_v15 = vrot.slane %v281_v6, 7  ;;  %v283_v23 = vrot.slane %v279_v16, 7  ;;  %v311_v41 = vmul.f32 -0.0104651805, %v274_v26  ;;  %v332_v48 = vmul.f32 -0.026021529, %v274_v26 }
  0x8e   : > { %v312_v58 = vmul.f32 -0.0104651805, %v275_v27  ;;  %v1393_v10 = vadd.s32 %v216_v19, %v213_v40  ;;  %vm224_vm13 = vcmp.eq.s32.totalorder %v1385_v53, 1  ;;  %vm221_vm15 = vcmp.eq.s32.totalorder %v1385_v53, 0 }
  0x8f   : > { %v287_v22 = vsel %vm268_vm2, %v284_v15, %v282_v12  ;;  %v285_v31 = vsel %vm268_vm2, %v283_v23, %v284_v15  ;;  %v286_v32 = vsel %vm268_vm2, %v282_v12, %v283_v23  ;;  %v317_v63 = vadd.f32 %v1329_v47, %v311_v41 }
  0x90   : > { %v289_v28 = vsel %vm288_vm6, %v287_v22, %v277_v49  ;;  %v229_v29 = vpop.permute.xlu1 %228  ;;  %v227_v34 = vpop.permute.xlu0 %226  ;;  %v290_v35 = vsel %vm288_vm6, %v286_v32, %v279_v16  ;;  %v291_v36 = vsel %vm288_vm6, %v285_v31, %v281_v6  ;;  %v333_v49 = vmul.f32 -0.026021529, %v275_v27 }
  0x91   : > { %v328_v30 = vmul.f32 0.031041987, %v289_v28  ;;  %v233_v33 = vrot.slane %v229_v29, 1  ;;  %v232_v39 = vrot.slane %v227_v34, 1  ;;  %v329_v43 = vmul.f32 0.031041987, %v290_v35 }
  0x92   : > { %v330_v44 = vmul.f32 0.031041987, %v291_v36  ;;  %v318_v47 = vadd.f32 %v1323_v45, %v312_v58  ;;  %vm225_vm1 = vcmp.eq.s32.totalorder %v1393_v10, 1  ;;  %vm222_vm3 = vcmp.eq.s32.totalorder %v1393_v10, 0 }
  0x93   : > { %v334_v42 = vadd.f32 %v331_v25, %v328_v30  ;;  %v237_v51 = vsel %vm2191_vm9, %v232_v39, %v233_v33  ;;  %v335_v37 = vadd.f32 %v332_v48, %v329_v43  ;;  %vm637_vm6 = vcmp.lt.s32.totalorder %v1308_v8, 64 }
  0x94   : > { %v244_v52 = vpop.permute.xlu1 %243  ;;  %v240_v56 = vsel %vm239_vm10, %v227_v34, %v237_v51  ;;  %v231_v59 = vpop.permute.xlu0 %230  ;;  %v336_v60 = vadd.f32 %v333_v49, %v330_v44 }
  0x95   : > { %v319_v61 = vmul.f32 0.031041987, %v240_v56  ;;  %v234_v62 = vrot.slane %v231_v59, 1  ;;  %v340_v6 = vadd.f32 %v337_v57, %v334_v42  ;;  %v295_v12 = vmul.f32 0.039880823, %v240_v56 }
  0x96   : > { %v249_v16 = vrot.slane %v244_v52, 1  ;;  %v341_v21 = vadd.f32 %v1334_v50, %v335_v37  ;;  %v342_v22 = vadd.f32 %v1341_v54, %v336_v60 }
  0x97   : > { %v322_v46 = vadd.f32 %v319_v61, %v316_v55  ;;  %v236_v13 = vsel %vm2191_vm9, %v233_v33, %v234_v62  ;;  %v238_v14 = vsel %vm2191_vm9, %v234_v62, %v232_v39  ;;  %v343_v28 = vadd.f32 0.03549399, %v340_v6 }
  0x98   : > { %v248_v15 = vpop.permute.xlu1 %247  ;;  %v241_v57 = vsel %vm239_vm10, %v229_v29, %v236_v13  ;;  %v242_v18 = vsel %vm239_vm10, %v231_v59, %v238_v14  ;;  %v246_v19 = vpop.permute.xlu0 %245  ;;  %v298_v29 = vadd.f32 %v295_v12, %v1352_v9  ;;  %v344_v44 = vadd.f32 0.03549399, %v341_v21 }
  0x99   : > { %v297_v23 = vmul.f32 0.039880823, %v242_v18  ;;  %v320_v24 = vmul.f32 0.031041987, %v241_v57  ;;  %v321_v25 = vmul.f32 0.031041987, %v242_v18 }
  0x9a   : > { %v251_v26 = vrot.slane %v248_v15, 1  ;;  %v296_v45 = vmul.f32 0.039880823, %v241_v57  ;;  %v250_v27 = vrot.slane %v246_v19, 1  ;;  %v325_v30 = vadd.f32 0.03549399, %v322_v46 }
  0x9b   : > { %v323_v31 = vadd.f32 %v320_v24, %v317_v63  ;;  %v300_v54 = vadd.f32 %v297_v23, %v1355_v11  ;;  %v324_v32 = vadd.f32 %v321_v25, %v318_v47  ;;  %v345_v56 = vadd.f32 0.03549399, %v342_v22 }
  0x9c   : > { %v432_v50 = vpop.permute.xlu1 %431  ;;  %v254_v33 = vsel %vm2191_vm9, %v251_v26, %v249_v16  ;;  %v252_v34 = vsel %vm2191_vm9, %v250_v27, %v251_v26  ;;  %v430_v35 = vpop.permute.xlu0 %429  ;;  %v299_v36 = vadd.f32 %v296_v45, %v1364_v20  ;;  %v253_v39 = vsel %vm2191_vm9, %v249_v16, %v250_v27 }
  0x9d   : > { %v258_v9 = vsel %vm255_vm11, %v248_v15, %v254_v33  ;;  %v257_v40 = vsel %vm255_vm11, %v246_v19, %v252_v34  ;;  %v326_v11 = vadd.f32 0.03549399, %v323_v31  ;;  %v256_v42 = vsel %vm255_vm11, %v244_v52, %v253_v39 }
  0x9e   : > { %v303_v41 = vmul.f32 0.0069296462, %v258_v9  ;;  %v302_v43 = vmul.f32 0.0069296462, %v257_v40  ;;  %v301_v48 = vmul.f32 0.0069296462, %v256_v42  ;;  %v346_v20 = vsel %vm223_vm12, %v325_v30, %v343_v28 }
  0x9f   : > { %v436_v49 = vrot.slane %v432_v50, 1  ;;  %v435_v51 = vrot.slane %v430_v35, 1  ;;  %v327_v60 = vadd.f32 0.03549399, %v324_v32  ;;  %v347_v52 = vsel %vm224_vm13, %v326_v11, %v344_v44 }
  0xa0   : > { %v483_v55 = vpop.permute.xlu1 %482  ;;  %v306_v58 = vadd.f32 %v303_v41, %v300_v54  ;;  %v305_v59 = vadd.f32 %v302_v43, %v299_v36  ;;  %v434_v37 = vpop.permute.xlu0 %433  ;;  %v304_v61 = vadd.f32 %v301_v48, %v298_v29 }
  0xa1   : > { %v439_v62 = vsel %vm2191_vm9, %v435_v51, %v436_v49  ;;  %v437_v63 = vrot.slane %v434_v37, 1  ;;  %v488_v18 = vrot.slane %v483_v55, 1  ;;  %v348_v26 = vsel %vm225_vm1, %v327_v60, %v345_v56 }
  0xa2   : > { %v309_v6 = vadd.f32 0.0044367486, %v306_v58  ;;  %v308_v12 = vadd.f32 0.0044367486, %v305_v59  ;;  %v441_v46 = vsel %vm422_vm14, %v430_v35, %v439_v62  ;;  %v307_v13 = vadd.f32 0.0044367486, %v304_v61 }
  0xa3   : > { %v444_v14 = vsub.f32 %v441_v46, %v1257_v4  ;;  %v438_v15 = vsel %vm2191_vm9, %v436_v49, %v437_v63  ;;  %v440_v16 = vsel %vm2191_vm9, %v437_v63, %v435_v51 }
  0xa4   : > { %v487_v47 = vpop.permute.xlu1 %486  ;;  %v1442_v57 = vsel %vm221_vm15, %v308_v12, %v347_v52  ;;  %v442_v19 = vsel %vm422_vm14, %v432_v50, %v438_v15  ;;  %v443_v21 = vsel %vm422_vm14, %v434_v37, %v440_v16  ;;  %v485_v22 = vpop.permute.xlu0 %484  ;;  %v1450_v23 = vsel %vm220_vm0, %v307_v13, %v346_v20 }
  0xa5   : > { %412 = vrot.lane.b32.xlu1 %v1442_v57, %s1186_s22  ;;  %v450_v24 = vand.u32 2147483647, %v444_v14  ;;  %v445_v53 = vsub.f32 %v442_v19, %v1252_v3  ;;  %v446_v25 = vsub.f32 %v443_v21, %v1264_v5  ;;  %410 = vrot.lane.b32.xlu0 %v1450_v23, %s1186_s22  ;;  %v490_v45 = vrot.slane %v487_v47, 1 }
  0xa6   : > { %v489_v27 = vrot.slane %v485_v22, 1  ;;  %v1462_v17 = vsel %vm222_vm3, %v309_v6, %v348_v26 }
  0xa7   : > { %v451_v28 = vand.u32 2147483647, %v445_v53  ;;  %v452_v29 = vand.u32 2147483647, %v446_v25  ;;  %v493_v31 = vsel %vm2191_vm9, %v490_v45, %v488_v18 }
  0xa8   : > { %v539_v30 = vpop.permute.xlu1 %538  ;;  %v491_v50 = vsel %vm2191_vm9, %v489_v27, %v490_v45  ;;  %v492_v54 = vsel %vm2191_vm9, %v488_v18, %v489_v27  ;;  %v537_v33 = vpop.permute.xlu0 %536  ;;  %v496_v34 = vsel %vm239_vm10, %v487_v47, %v493_v31 }
  0xa9   : > { %v543_v32 = vrot.slane %v539_v30, 7  ;;  %464 = vrot.lane.b32.xlu1 %v1450_v23, %s1184_s17  ;;  %v455_v10 = vadd.f32 %v451_v28, %v450_v24  ;;  %v494_v35 = vsel %vm239_vm10, %v483_v55, %v492_v54  ;;  %v495_v9 = vsel %vm239_vm10, %v485_v22, %v491_v50  ;;  %414 = vrot.lane.b32.xlu0 %v1462_v17, %s1186_s22 }
  0xaa   : > { %v499_v36 = vsub.f32 %v496_v34, %v1264_v5  ;;  %v497_v39 = vsub.f32 %v494_v35, %v1257_v4  ;;  %v498_v40 = vsub.f32 %v495_v9, %v1252_v3  ;;  %v542_v11 = vrot.slane %v537_v33, 7 }
  0xab   : > { %v1484_v41 = vadd.f32 %v455_v10, %v452_v29 }
  0xac   : > { %v591_v42 = vpop.permute.xlu1 %590  ;;  %v505_v43 = vand.u32 2147483647, %v499_v36  ;;  %v503_v44 = vand.u32 2147483647, %v497_v39  ;;  %v504_v48 = vand.u32 2147483647, %v498_v40  ;;  %v546_v49 = vsel %vm268_vm2, %v542_v11, %v543_v32  ;;  %v541_v51 = vpop.permute.xlu0 %540 }
  0xad   : > { %468 = vrot.lane.b32.xlu1 %v1462_v17, %s1184_s17  ;;  %v549_v55 = vsel %vm529_vm4, %v546_v49, %v539_v30  ;;  %v544_v56 = vrot.slane %v541_v51, 7  ;;  %466 = vrot.lane.b32.xlu0 %v1442_v57, %s1184_s17  ;;  %v596_v59 = vrot.slane %v591_v42, 1 }
  0xae   : > { %v508_v20 = vadd.f32 %v504_v48, %v503_v44  ;;  %v552_v58 = vsub.f32 %v549_v55, %v1252_v3 }
  0xaf   : > { %v545_v37 = vsel %vm268_vm2, %v543_v32, %v544_v56  ;;  %v547_v60 = vsel %vm268_vm2, %v544_v56, %v542_v11 }
  0xb0   : > { %v595_v61 = vpop.permute.xlu1 %594  ;;  %v1500_v62 = vadd.f32 %v508_v20, %v505_v43  ;;  %v558_v63 = vand.u32 2147483647, %v552_v58  ;;  %v548_v52 = vsel %vm529_vm4, %v547_v60, %v537_v33  ;;  %v550_v6 = vsel %vm529_vm4, %v545_v37, %v541_v51  ;;  %v593_v12 = vpop.permute.xlu0 %592 }
  0xb1   : > { %519 = vrot.lane.b32.xlu1 %v1442_v57, %s1187_s23  ;;  %v551_v46 = vsub.f32 %v548_v52, %v1257_v4  ;;  %v553_v13 = vsub.f32 %v550_v6, %v1264_v5  ;;  %v598_v14 = vrot.slane %v595_v61, 1  ;;  %v597_v15 = vrot.slane %v593_v12, 1  ;;  %517 = vrot.lane.b32.xlu0 %v1450_v23, %s1187_s23 }
  0xb3   : > { %v557_v16 = vand.u32 2147483647, %v551_v46  ;;  %v559_v47 = vand.u32 2147483647, %v553_v13  ;;  %v601_v18 = vsel %vm2191_vm9, %v598_v14, %v596_v59  ;;  %v599_v19 = vsel %vm2191_vm9, %v597_v15, %v598_v14 }
  0xb4   : > { %v647_v21 = vpop.permute.xlu1 %646  ;;  %v604_v22 = vsel %vm583_vm5, %v595_v61, %v601_v18  ;;  %v600_v24 = vsel %vm2191_vm9, %v596_v59, %v597_v15  ;;  %v603_v53 = vsel %vm583_vm5, %v593_v12, %v599_v19  ;;  %v645_v26 = vpop.permute.xlu0 %644 }
  0xb5   : > { %v651_v25 = vrot.slane %v647_v21, 1  ;;  %571 = vrot.lane.b32.xlu1 %v1450_v23, %s1188_s24  ;;  %v562_v45 = vadd.f32 %v558_v63, %v557_v16  ;;  %v607_v27 = vsub.f32 %v604_v22, %v1264_v5  ;;  %v602_v28 = vsel %vm583_vm5, %v591_v42, %v600_v24  ;;  %521 = vrot.lane.b32.xlu0 %v1462_v17, %s1187_s23 }
  0xb6   : > { %v606_v29 = vsub.f32 %v603_v53, %v1252_v3  ;;  %v605_v30 = vsub.f32 %v602_v28, %v1257_v4  ;;  %v650_v31 = vrot.slane %v645_v26, 1 }
  0xb7   : > { %v1532_v50 = vadd.f32 %v562_v45, %v559_v47  ;;  %v613_v33 = vand.u32 2147483647, %v607_v27 }
  0xb8   : > { %v612_v54 = vand.u32 2147483647, %v606_v29  ;;  %v698_v32 = vpop.permute.xlu1 %697  ;;  %v611_v10 = vand.u32 2147483647, %v605_v30  ;;  %v654_v34 = vsel %vm2191_vm9, %v650_v31, %v651_v25  ;;  %v649_v35 = vpop.permute.xlu0 %648 }
  0xb9   : > { %575 = vrot.lane.b32.xlu1 %v1462_v17, %s1188_s24  ;;  %v656_v9 = vsel %vm637_vm6, %v645_v26, %v654_v34  ;;  %v652_v36 = vrot.slane %v649_v35, 1  ;;  %573 = vrot.lane.b32.xlu0 %v1442_v57, %s1188_s24  ;;  %v703_v11 = vrot.slane %v698_v32, 1 }
  0xba   : > { %v616_v39 = vadd.f32 %v612_v54, %v611_v10  ;;  %v659_v40 = vsub.f32 %v656_v9, %v1257_v4 }
  0xbb   : > { %v653_v42 = vsel %vm2191_vm9, %v651_v25, %v652_v36  ;;  %v655_v43 = vsel %vm2191_vm9, %v652_v36, %v650_v31 }
  0xbc   : > { %v702_v44 = vpop.permute.xlu1 %701  ;;  %v1547_v48 = vadd.f32 %v616_v39, %v613_v33  ;;  %v665_v49 = vand.u32 2147483647, %v659_v40  ;;  %v657_v51 = vsel %vm637_vm6, %v647_v21, %v653_v42  ;;  %v658_v55 = vsel %vm637_vm6, %v649_v35, %v655_v43  ;;  %v700_v56 = vpop.permute.xlu0 %699 }
  0xbd   : > { %627 = vrot.lane.b32.xlu1 %v1442_v57, %s1189_s25  ;;  %v660_v20 = vsub.f32 %v657_v51, %v1252_v3  ;;  %v661_v58 = vsub.f32 %v658_v55, %v1264_v5  ;;  %v705_v59 = vrot.slane %v702_v44, 1  ;;  %v704_v37 = vrot.slane %v700_v56, 1  ;;  %625 = vrot.lane.b32.xlu0 %v1450_v23, %s1189_s25 }
  0xbf   : > { %v666_v60 = vand.u32 2147483647, %v660_v20  ;;  %v667_v61 = vand.u32 2147483647, %v661_v58  ;;  %v708_v63 = vsel %vm2191_vm9, %v705_v59, %v703_v11  ;;  %v706_v52 = vsel %vm2191_vm9, %v704_v37, %v705_v59 }
  0xc0   : > { %v754_v6 = vpop.permute.xlu1 %753  ;;  %v711_v12 = vsel %vm255_vm11, %v702_v44, %v708_v63  ;;  %v707_v46 = vsel %vm2191_vm9, %v703_v11, %v704_v37  ;;  %v710_v13 = vsel %vm255_vm11, %v700_v56, %v706_v52  ;;  %v752_v14 = vpop.permute.xlu0 %751 }
  0xc1   : > { %v758_v15 = vrot.slane %v754_v6, 7  ;;  %679 = vrot.lane.b32.xlu1 %v1450_v23, %s1185_s18  ;;  %v670_v16 = vadd.f32 %v666_v60, %v665_v49  ;;  %v714_v47 = vsub.f32 %v711_v12, %v1264_v5  ;;  %v709_v18 = vsel %vm255_vm11, %v698_v32, %v707_v46  ;;  %629 = vrot.lane.b32.xlu0 %v1462_v17, %s1189_s25 }
  0xc2   : > { %v713_v19 = vsub.f32 %v710_v13, %v1252_v3  ;;  %v712_v21 = vsub.f32 %v709_v18, %v1257_v4  ;;  %v757_v22 = vrot.slane %v752_v14, 7  ;;  %v798_v24 = vrot.slane %v752_v14, 1 }
  0xc3   : > { %v799_v53 = vrot.slane %v754_v6, 1  ;;  %v1579_v25 = vadd.f32 %v670_v16, %v667_v61  ;;  %v720_v45 = vand.u32 2147483647, %v714_v47  ;;  %v352_v13 = vsub.f32 %v1257_v4, %v1227_v1 }
  0xc4   : > { %v719_v26 = vand.u32 2147483647, %v713_v19  ;;  %v718_v27 = vand.u32 2147483647, %v712_v21  ;;  %v761_v28 = vsel %vm268_vm2, %v757_v22, %v758_v15  ;;  %v756_v30 = vpop.permute.xlu0 %755  ;;  %v354_v16 = vsub.f32 %v1264_v5, %v1224_v0  ;;  %v1657_v1 = vpop.permute.xlu1 %846 }
  0xc5   : > { %v802_v29 = vsel %vm2191_vm9, %v798_v24, %v799_v53  ;;  %683 = vrot.lane.b32.xlu1 %v1462_v17, %s1185_s18  ;;  %v764_v31 = vsel %vm744_vm7, %v761_v28, %v754_v6  ;;  %v759_v32 = vrot.slane %v756_v30, 7  ;;  %v800_v33 = vrot.slane %v756_v30, 1  ;;  %681 = vrot.lane.b32.xlu0 %v1442_v57, %s1185_s18 }
  0xc6   : > { %v804_v54 = vsel %vm744_vm7, %v752_v14, %v802_v29  ;;  %v723_v10 = vadd.f32 %v719_v26, %v718_v27  ;;  %v767_v34 = vsub.f32 %v764_v31, %v1252_v3  ;;  %v355_v47 = vmul.f32 %v352_v13, %v352_v13 }
  0xc7   : > { %v807_v35 = vsub.f32 %v804_v54, %v1257_v4  ;;  %v760_v9 = vsel %vm268_vm2, %v758_v15, %v759_v32  ;;  %v762_v36 = vsel %vm268_vm2, %v759_v32, %v757_v22  ;;  %v801_v39 = vsel %vm2191_vm9, %v799_v53, %v800_v33 }
  0xc8   : > { %v803_v40 = vsel %vm2191_vm9, %v800_v33, %v798_v24  ;;  %v1603_v11 = vadd.f32 %v723_v10, %v720_v45  ;;  %v773_v42 = vand.u32 2147483647, %v767_v34  ;;  %v763_v43 = vsel %vm744_vm7, %v762_v36, %v752_v14 }
  0xc9   : > { %734 = vrot.lane.b32.xlu1 %v1442_v57, %s1190_s26  ;;  %v765_v44 = vsel %vm744_vm7, %v760_v9, %v756_v30  ;;  %v766_v49 = vsub.f32 %v763_v43, %v1257_v4  ;;  %v805_v51 = vsel %vm744_vm7, %v754_v6, %v801_v39  ;;  %v806_v55 = vsel %vm744_vm7, %v756_v30, %v803_v40 }
  0xca   : > { %732 = vrot.lane.b32.xlu0 %v1450_v23, %s1190_s26  ;;  %v813_v56 = vand.u32 2147483647, %v807_v35  ;;  %v768_v20 = vsub.f32 %v765_v44, %v1264_v5  ;;  %v808_v58 = vsub.f32 %v805_v51, %v1252_v3  ;;  %v809_v59 = vsub.f32 %v806_v55, %v1264_v5 }
  0xcb   : > { %v772_v37 = vand.u32 2147483647, %v766_v49  ;;  %v353_v14 = vsub.f32 %v1252_v3, %v1230_v2  ;;  %v370_v15 = vmul.u32 128, %v1306_v7  ;;  %v357_v21 = vmul.f32 %v354_v16, %v354_v16 }
  0xcc   : > { %v774_v60 = vand.u32 2147483647, %v768_v20  ;;  %v814_v61 = vand.u32 2147483647, %v808_v58  ;;  %v815_v63 = vand.u32 2147483647, %v809_v59 }
  0xcd   : > { %827 = vrot.lane.b32.xlu1 %v1450_v23, %s1191_s27  ;;  %v777_v52 = vadd.f32 %v773_v42, %v772_v37  ;;  %v356_v18 = vmul.f32 %v353_v14, %v353_v14  ;;  %v371_v19 = vadd.s32 %v370_v15, %v1308_v8 }
  0xce   : > { %736 = vrot.lane.b32.xlu0 %v1462_v17, %s1190_s26  ;;  %v818_v6 = vadd.f32 %v814_v61, %v813_v56 }
  0xcf   : > { %v1625_v12 = vadd.f32 %v777_v52, %v774_v60  ;;  %v358_v22 = vadd.f32 %v356_v18, %v355_v47  ;;  %v372_v24 = vcvt.s32.f32 %v371_v19 }
  0xd0   : > { %v1627_v46 = vadd.f32 %v818_v6, %v815_v63 }
  0xd1   : > { %831 = vrot.lane.b32.xlu1 %v1462_v17, %s1191_s27  ;;  %v359_v53 = vadd.f32 %v358_v22, %v357_v21  ;;  %v373_v26 = vmul.f32 0.03125, %v372_v24 }
  0xd2   : > { %829 = vrot.lane.b32.xlu0 %v1442_v57, %s1191_s27 }
  0xd3   : > { %v374_v45 = vfloor.f32 %v373_v26 }
  0xd5   : > { %883 = vrot.lane.b32.xlu1 %v1442_v57, %s1193_s28 }
  0xd6   : > { %881 = vrot.lane.b32.xlu0 %v1450_v23, %s1193_s28 }
  0xd9   : > { %935 = vrot.lane.b32.xlu1 %v1450_v23, %s1194_s29 }
  0xda   : > { %885 = vrot.lane.b32.xlu0 %v1462_v17, %s1193_s28 }
  0xdd   : > { %939 = vrot.lane.b32.xlu1 %v1462_v17, %s1194_s29 }
  0xde   : > { %937 = vrot.lane.b32.xlu0 %v1442_v57, %s1194_s29 }
  0xe1   : > { %850 = vrot.lane.b32.xlu1 %v1264_v5, %s1191_s27 }
  0xe2   : > { %848 = vrot.lane.b32.xlu0 %v1252_v3, %s1191_s27 }
  0xe5   : > { %902 = vrot.lane.b32.xlu1 %v1252_v3, %s1193_s28 }
  0xe6   : > { %900 = vrot.lane.b32.xlu0 %v1257_v4, %s1193_s28 }
  0xe9   : > { %954 = vrot.lane.b32.xlu1 %v1257_v4, %s1194_s29  ;;  %v1122_v4 = vtrunc.f32 %v374_v45 }
  0xea   : > { %904 = vrot.lane.b32.xlu0 %v1264_v5, %s1193_s28 }
  0xeb   : > { %v1123_v2 = vcvt.f32.s32 %v1122_v4 }
  0xed   : > { %958 = vrot.lane.b32.xlu1 %v1264_v5, %s1194_s29  ;;  %v376_v0 = vmul.u32 32, %v1123_v2 }
  0xee   : > { %956 = vrot.lane.b32.xlu0 %v1252_v3, %s1194_s29 }
  0xef   : > { %v1663_v33 = vsub.s32 %v371_v19, %v376_v0 }
  0xf1   : > { %vm378_vm8 = vcmp.ge.s32.totalorder %v1663_v33, 32  ;;  %vm380_vm12 = vcmp.lt.s32.totalorder %v1663_v33, 0 }
  0xf2   : > { %v379_v19 = vsel %vm378_vm8, 1, %v1192_v38 }
 0x10d   : > { %360 = vadd.xlane.f32.xlu0 %v359_v53 }
 0x117   : > { %v413_v3 = vpop.permute.xlu1 %412  ;;  %v411_v28 = vpop.permute.xlu0 %410 }
 0x118   : > { %v417_v27 = vrot.slane %v413_v3, 1  ;;  %v416_v29 = vrot.slane %v411_v28, 1 }
 0x11a   : > { %v420_v5 = vsel %vm2191_vm9, %v416_v29, %v417_v27 }
 0x11b   : > { %v465_v30 = vpop.permute.xlu1 %464  ;;  %v423_v31 = vsel %vm422_vm14, %v411_v28, %v420_v5  ;;  %v415_v54 = vpop.permute.xlu0 %414  ;;  %v382_v28 = vadd.s32 %v1123_v2, %v379_v19  ;;  %v381_v5 = vsel %vm380_vm12, 1, %v1192_v38 }
 0x11c   : > { %v418_v32 = vrot.slane %v415_v54, 1  ;;  %v426_v10 = vsub.f32 %v423_v31, %v1450_v23  ;;  %v470_v36 = vrot.slane %v465_v30, 1 }
 0x11e   : > { %v419_v34 = vsel %vm2191_vm9, %v417_v27, %v418_v32  ;;  %v421_v35 = vsel %vm2191_vm9, %v418_v32, %v416_v29  ;;  %v447_v56 = vmul.f32 %v426_v10, %v426_v10 }
 0x11f   : > { %v469_v9 = vpop.permute.xlu1 %468  ;;  %v424_v39 = vsel %vm422_vm14, %v413_v3, %v419_v34  ;;  %v425_v40 = vsel %vm422_vm14, %v415_v54, %v421_v35  ;;  %v467_v43 = vpop.permute.xlu0 %466 }
 0x120   : > { %v472_v42 = vrot.slane %v469_v9, 1  ;;  %v427_v44 = vsub.f32 %v424_v39, %v1442_v57  ;;  %v428_v49 = vsub.f32 %v425_v40, %v1462_v17  ;;  %v471_v51 = vrot.slane %v467_v43, 1 }
 0x122   : > { %v475_v55 = vsel %vm2191_vm9, %v472_v42, %v470_v36  ;;  %v448_v20 = vmul.f32 %v427_v44, %v427_v44  ;;  %v473_v59 = vsel %vm2191_vm9, %v471_v51, %v472_v42  ;;  %v449_v60 = vmul.f32 %v428_v49, %v428_v49 }
 0x123   : > { %v478_v58 = vsel %vm239_vm10, %v469_v9, %v475_v55  ;;  %v520_v37 = vpop.permute.xlu1 %519  ;;  %v474_v61 = vsel %vm2191_vm9, %v470_v36, %v471_v51  ;;  %v477_v63 = vsel %vm239_vm10, %v467_v43, %v473_v59  ;;  %v518_v6 = vpop.permute.xlu0 %517  ;;  %v1712_v43 = vsub.s32 %v382_v28, %v381_v5 }
 0x124   : > { %v524_v52 = vrot.slane %v520_v37, 7  ;;  %v453_v13 = vadd.f32 %v448_v20, %v447_v56  ;;  %v476_v14 = vsel %vm239_vm10, %v465_v30, %v474_v61  ;;  %v480_v15 = vsub.f32 %v477_v63, %v1442_v57 }
 0x125   : > { %v523_v16 = vrot.slane %v518_v6, 7  ;;  %v481_v47 = vsub.f32 %v478_v58, %v1462_v17  ;;  %v479_v18 = vsub.f32 %v476_v14, %v1450_v23  ;;  %v384_v30 = vmul.u32 32, %v379_v19 }
 0x126   : > { %v454_v21 = vadd.f32 %v453_v13, %v449_v60  ;;  %v501_v22 = vmul.f32 %v480_v15, %v480_v15  ;;  %v386_v55 = vmul.u32 32, %v381_v5  ;;  %vm393_vm10 = vcmp.ge.s32.totalorder %v1712_v43, 0 }
 0x127   : > { %v527_v24 = vsel %vm268_vm2, %v523_v16, %v524_v52  ;;  %v572_v53 = vpop.permute.xlu1 %571  ;;  %v500_v26 = vmul.f32 %v479_v18, %v479_v18  ;;  %v522_v4 = vpop.permute.xlu0 %521  ;;  %v502_v29 = vmul.f32 %v481_v47, %v481_v47  ;;  %v385_v51 = vsub.s32 %v1663_v33, %v384_v30 }
 0x128   : > { %v531_v45 = vsel %vm529_vm4, %v527_v24, %v520_v37  ;;  %v457_v3 = vsub.f32 -6.899723, %v454_v21  ;;  %v525_v27 = vrot.slane %v522_v4, 7  ;;  %v577_v54 = vrot.slane %v572_v53, 1 }
 0x129   : > { %v506_v0 = vadd.f32 %v501_v22, %v500_v26  ;;  %v534_v31 = vsub.f32 %v531_v45, %v1442_v57  ;;  %v1730_v24 = vadd.s32 %v386_v55, %v385_v51  ;;  %v852_v26 = vrot.slane %v1657_v1, 7 }
 0x12a   : > { %v526_v32 = vsel %vm268_vm2, %v524_v52, %v525_v27  ;;  %v528_v10 = vsel %vm268_vm2, %v525_v27, %v523_v16  ;;  %v458_v35 = vmul.f32 1.442695, %v457_v3  ;;  %vm395_vm13 = vcmp.lt.s32.totalorder %v1712_v43, 31 }
 0x12b   : > { %v576_v34 = vpop.permute.xlu1 %575  ;;  %v530_v9 = vsel %vm529_vm4, %v528_v10, %v518_v6  ;;  %v532_v2 = vsel %vm529_vm4, %v526_v32, %v522_v4  ;;  %v574_v38 = vpop.permute.xlu0 %573  ;;  %v507_v44 = vadd.f32 %v506_v0, %v502_v29  ;;  %v555_v56 = vmul.f32 %v534_v31, %v534_v31  ;;  %vm1771_vm0 = vmand %vm393_vm10, %vm395_vm13 }
 0x12c   : > { %v579_v36 = vrot.slane %v576_v34, 1  ;;  %v533_v39 = vsub.f32 %v530_v9, %v1450_v23  ;;  %v535_v40 = vsub.f32 %v532_v2, %v1462_v17  ;;  %v578_v42 = vrot.slane %v574_v38, 1 }
 0x12d   : > { %1147 = vpow2.f32 %v458_v35  ;;  %v510_v15 = vsub.f32 -6.899723, %v507_v44  ;;  %vm2190_vm14 = vcmp.lt.s32.totalorder %v1730_v24, 32  ;;  %vm404_vm15 = vcmp.ge.s32.totalorder %v1730_v24, 0 }
 0x12e   : > { %v582_v49 = vsel %vm2191_vm9, %v579_v36, %v577_v54  ;;  %v554_v20 = vmul.f32 %v533_v39, %v533_v39  ;;  %v580_v59 = vsel %vm2191_vm9, %v578_v42, %v579_v36  ;;  %v556_v60 = vmul.f32 %v535_v40, %v535_v40  ;;  %vm1783_vm1 = vmand %vm404_vm15, %vm2190_vm14 }
 0x12f   : > { %v586_v58 = vsel %vm583_vm5, %v576_v34, %v582_v49  ;;  %v628_v37 = vpop.permute.xlu1 %627  ;;  %v581_v61 = vsel %vm2191_vm9, %v577_v54, %v578_v42  ;;  %v585_v63 = vsel %vm583_vm5, %v574_v38, %v580_v59  ;;  %v626_v52 = vpop.permute.xlu0 %625  ;;  %v511_v29 = vmul.f32 1.442695, %v510_v15  ;;  %vm461_vm3 = vmand %vm1771_vm0, %vm1783_vm1 }
 0x130   : > { %v560_v33 = vadd.f32 %v555_v56, %v554_v20  ;;  %v584_v6 = vsel %vm583_vm5, %v572_v53, %v581_v61  ;;  %v588_v13 = vsub.f32 %v585_v63, %v1442_v57  ;;  %v632_v14 = vrot.slane %v628_v37, 1 }
 0x131   : > { %v589_v16 = vsub.f32 %v586_v58, %v1462_v17  ;;  %v587_v47 = vsub.f32 %v584_v6, %v1450_v23  ;;  %v631_v18 = vrot.slane %v626_v52, 1  ;;  %1149 = vpow2.f32 %v511_v29 }
 0x132   : > { %v561_v19 = vadd.f32 %v560_v33, %v556_v60  ;;  %v609_v21 = vmul.f32 %v588_v13, %v588_v13  ;;  %vm893_vm4 = vcmp.lt.s32.totalorder %v1308_v8, 98  ;;  %vm2189_vm5 = vcmp.lt.s32.totalorder %v1308_v8, 66 }
 0x133   : > { %v680_v22 = vpop.permute.xlu1 %679  ;;  %v608_v45 = vmul.f32 %v587_v47, %v587_v47  ;;  %v635_v53 = vsel %vm2191_vm9, %v631_v18, %v632_v14  ;;  %v630_v4 = vpop.permute.xlu0 %629  ;;  %v610_v0 = vmul.f32 %v589_v16, %v589_v16  ;;  %vm402_vm8 = vcmp.ge.s32.totalorder %v1730_v24, 1 }
 0x134   : > { %v564_v3 = vsub.f32 -6.8679743, %v561_v19  ;;  %v638_v27 = vsel %vm637_vm6, %v626_v52, %v635_v53  ;;  %v633_v28 = vrot.slane %v630_v4, 1  ;;  %v685_v36 = vrot.slane %v680_v22, 1 }
 0x135   : > { %v614_v5 = vadd.f32 %v609_v21, %v608_v45  ;;  %v641_v30 = vsub.f32 %v638_v27, %v1450_v23  ;;  %vm406_vm12 = vcmp.lt.s32.totalorder %v1730_v24, 31  ;;  %vm388_vm13 = vcmp.ge.s32.totalorder %v1712_v43, 2 }
 0x136   : > { %v565_v31 = vmul.f32 1.442695, %v564_v3  ;;  %v634_v54 = vsel %vm2191_vm9, %v632_v14, %v633_v28  ;;  %v636_v32 = vsel %vm2191_vm9, %v633_v28, %v631_v18 }
 0x137   : > { %v684_v10 = vpop.permute.xlu1 %683  ;;  %v615_v34 = vadd.f32 %v614_v5, %v610_v0  ;;  %v639_v35 = vsel %vm637_vm6, %v628_v37, %v634_v54  ;;  %v640_v9 = vsel %vm637_vm6, %v630_v4, %v636_v32  ;;  %v682_v2 = vpop.permute.xlu0 %681  ;;  %v662_v49 = vmul.f32 %v641_v30, %v641_v30 }
 0x138   : > { %v642_v38 = vsub.f32 %v639_v35, %v1442_v57  ;;  %v643_v39 = vsub.f32 %v640_v9, %v1462_v17  ;;  %v687_v40 = vrot.slane %v684_v10, 1  ;;  %v1148_v42 = vpop.eup %1147  ;;  %v686_v51 = vrot.slane %v682_v2, 1 }
 0x139   : > { %v618_v44 = vsub.f32 -6.8679743, %v615_v34  ;;  %1151 = vpow2.f32 %v565_v31  ;;  %v460_v18 = vmul.f32 %v1148_v42, %v1484_v41  ;;  %vm391_vm6 = vcmp.ge.s32.totalorder %v1712_v43, 1 }
 0x13a   : > { %v663_v55 = vmul.f32 %v642_v38, %v642_v38  ;;  %v664_v56 = vmul.f32 %v643_v39, %v643_v39  ;;  %v690_v20 = vsel %vm2191_vm9, %v687_v40, %v685_v36  ;;  %v688_v60 = vsel %vm2191_vm9, %v686_v51, %v687_v40 }
 0x13b   : > { %v735_v58 = vpop.permute.xlu1 %734  ;;  %v619_v59 = vmul.f32 1.442695, %v618_v44  ;;  %v693_v37 = vsel %vm255_vm11, %v684_v10, %v690_v20  ;;  %v689_v61 = vsel %vm2191_vm9, %v685_v36, %v686_v51  ;;  %v692_v13 = vsel %vm255_vm11, %v682_v2, %v688_v60  ;;  %v1803_v38 = vpop.eup %1149 }
 0x13c   : > { %v733_v63 = vpop.permute.xlu0 %732  ;;  %v668_v52 = vadd.f32 %v663_v55, %v662_v49  ;;  %v696_v33 = vsub.f32 %v693_v37, %v1462_v17  ;;  %v691_v6 = vsel %vm255_vm11, %v680_v22, %v689_v61  ;;  %v695_v15 = vsub.f32 %v692_v13, %v1442_v57 }
 0x13d   : > { %v694_v14 = vsub.f32 %v691_v6, %v1450_v23  ;;  %v739_v16 = vrot.slane %v735_v58, 7  ;;  %1153 = vpow2.f32 %v619_v59  ;;  %v787_v21 = vrot.slane %v735_v58, 1 }
 0x13e   : > { %v669_v19 = vadd.f32 %v668_v52, %v664_v56  ;;  %v738_v22 = vrot.slane %v733_v63, 7  ;;  %vm839_vm11 = vcmp.lt.s32.totalorder %v1308_v8, 34  ;;  %v717_v4 = vmul.f32 %v696_v33, %v696_v33 }
 0x13f   : > { %v1776_v45 = vpop.permute.xlu1 %827  ;;  %v715_v3 = vmul.f32 %v694_v14, %v694_v14  ;;  %v716_v27 = vmul.f32 %v695_v15, %v695_v15  ;;  %v786_v41 = vrot.slane %v733_v63, 1  ;;  %v1821_v20 = vsel %vm461_vm3, %v460_v18, 0.0 }
 0x140   : > { %v737_v28 = vpop.permute.xlu0 %736  ;;  %v672_v29 = vsub.f32 -6.8669333, %v669_v19  ;;  %v742_v0 = vsel %vm268_vm2, %v738_v22, %v739_v16  ;;  %v833_v5 = vrot.slane %v1776_v45, 7 }
 0x141   : > { %v740_v30 = vrot.slane %v737_v28, 7  ;;  %v721_v31 = vadd.f32 %v716_v27, %v715_v3  ;;  %v746_v54 = vsel %vm744_vm7, %v742_v0, %v735_v58  ;;  %v790_v32 = vsel %vm2191_vm9, %v786_v41, %v787_v21 }
 0x142   : > { %v788_v10 = vrot.slane %v737_v28, 1  ;;  %v673_v34 = vmul.f32 1.442695, %v672_v29  ;;  %v749_v35 = vsub.f32 %v746_v54, %v1442_v57  ;;  %v792_v9 = vsel %vm744_vm7, %v733_v63, %v790_v32 }
 0x143   : > { %v741_v2 = vsel %vm268_vm2, %v739_v16, %v740_v30  ;;  %v832_v36 = vpop.permute.xlu1 %831  ;;  %v722_v39 = vadd.f32 %v721_v31, %v717_v4  ;;  %v795_v40 = vsub.f32 %v792_v9, %v1450_v23  ;;  %v743_v42 = vsel %vm268_vm2, %v740_v30, %v738_v22  ;;  %v1810_v51 = vpop.eup %1151 }
 0x144   : > { %v747_v44 = vsel %vm744_vm7, %v741_v2, %v737_v28  ;;  %v830_v49 = vpop.permute.xlu0 %829  ;;  %1155 = vpow2.f32 %v673_v34  ;;  %v745_v55 = vsel %vm744_vm7, %v743_v42, %v733_v63  ;;  %v770_v37 = vmul.f32 %v749_v35, %v749_v35 }
 0x145   : > { %v750_v56 = vsub.f32 %v747_v44, %v1462_v17  ;;  %v725_v59 = vsub.f32 -6.8669333, %v722_v39  ;;  %v748_v60 = vsub.f32 %v745_v55, %v1450_v23  ;;  %v789_v61 = vsel %vm2191_vm9, %v787_v21, %v788_v10 }
 0x146   : > { %v810_v52 = vmul.f32 %v795_v40, %v795_v40  ;;  %v791_v63 = vsel %vm2191_vm9, %v788_v10, %v786_v41  ;;  %v793_v33 = vsel %vm744_vm7, %v735_v58, %v789_v61  ;;  %v835_v6 = vrot.slane %v832_v36, 7 }
 0x147   : > { %v884_v13 = vpop.permute.xlu1 %883  ;;  %v769_v14 = vmul.f32 %v748_v60, %v748_v60  ;;  %v771_v15 = vmul.f32 %v750_v56, %v750_v56  ;;  %v794_v16 = vsel %vm744_vm7, %v737_v28, %v791_v63  ;;  %v796_v18 = vsub.f32 %v793_v33, %v1442_v57  ;;  %v1833_v22 = vpop.eup %1153 }
 0x148   : > { %v882_v19 = vpop.permute.xlu0 %881  ;;  %v726_v21 = vmul.f32 1.442695, %v725_v59  ;;  %v797_v4 = vsub.f32 %v794_v16, %v1462_v17  ;;  %v838_v3 = vsel %vm268_vm2, %v835_v6, %v833_v5  ;;  %v834_v27 = vrot.slane %v830_v49, 7 }
 0x149   : > { %v775_v58 = vadd.f32 %v770_v37, %v769_v14  ;;  %v811_v41 = vmul.f32 %v796_v18, %v796_v18  ;;  %v840_v29 = vsel %vm839_vm11, %v838_v3, %v1776_v45  ;;  %v888_v0 = vrot.slane %v884_v13, 1 }
 0x14a   : > { %v812_v28 = vmul.f32 %v797_v4, %v797_v4  ;;  %v843_v30 = vsub.f32 %v840_v29, %v1450_v23  ;;  %v836_v31 = vsel %vm268_vm2, %v834_v27, %v835_v6  ;;  %v837_v54 = vsel %vm268_vm2, %v833_v5, %v834_v27 }
 0x14b   : > { %v1847_v32 = vpop.permute.xlu1 %935  ;;  %v776_v10 = vadd.f32 %v775_v58, %v771_v15  ;;  %v816_v34 = vadd.f32 %v811_v41, %v810_v52  ;;  %v841_v35 = vsel %vm839_vm11, %v837_v54, %v830_v49  ;;  %v842_v45 = vsel %vm839_vm11, %v836_v31, %v832_v36 }
 0x14c   : > { %v886_v9 = vpop.permute.xlu0 %885  ;;  %v864_v2 = vmul.f32 %v843_v30, %v843_v30  ;;  %v844_v39 = vsub.f32 %v841_v35, %v1442_v57  ;;  %v845_v40 = vsub.f32 %v842_v45, %v1462_v17  ;;  %v887_v42 = vrot.slane %v882_v19, 1 }
 0x14d   : > { %1157 = vpow2.f32 %v726_v21  ;;  %v779_v44 = vsub.f32 -6.8351846, %v776_v10  ;;  %v817_v5 = vadd.f32 %v816_v34, %v812_v28  ;;  %v941_v55 = vrot.slane %v1847_v32, 7 }
 0x14e   : > { %v1856_v56 = vpop.eup %1155  ;;  %v865_v59 = vmul.f32 %v844_v39, %v844_v39  ;;  %v866_v37 = vmul.f32 %v845_v40, %v845_v40  ;;  %v891_v49 = vsel %vm2191_vm9, %v887_v42, %v888_v0  ;;  %v889_v36 = vrot.slane %v886_v9, 1 }
 0x14f   : > { %v940_v60 = vpop.permute.xlu1 %939  ;;  %v780_v61 = vmul.f32 1.442695, %v779_v44  ;;  %v820_v52 = vsub.f32 -6.8351846, %v817_v5  ;;  %v894_v63 = vsel %vm893_vm4, %v882_v19, %v891_v49  ;;  %v989_v21 = vrot.slane %v1847_v32, 1 }
 0x150   : > { %v943_v33 = vrot.slane %v940_v60, 7  ;;  %v938_v6 = vpop.permute.xlu0 %937  ;;  %v870_v14 = vadd.f32 %v865_v59, %v864_v2  ;;  %v897_v15 = vsub.f32 %v894_v63, %v1450_v23  ;;  %v890_v16 = vsel %vm2191_vm9, %v888_v0, %v889_v36 }
 0x151   : > { %v892_v18 = vsel %vm2191_vm9, %v889_v36, %v887_v42  ;;  %1159 = vpow2.f32 %v780_v61  ;;  %v895_v4 = vsel %vm893_vm4, %v884_v13, %v890_v16  ;;  %v821_v3 = vmul.f32 1.442695, %v820_v52 }
 0x152   : > { %v896_v19 = vsel %vm893_vm4, %v886_v9, %v892_v18  ;;  %v871_v27 = vadd.f32 %v870_v14, %v866_v37  ;;  %v898_v58 = vsub.f32 %v895_v4, %v1442_v57  ;;  %v918_v0 = vmul.f32 %v897_v15, %v897_v15 }
 0x153   : > { %v899_v41 = vsub.f32 %v896_v19, %v1462_v17  ;;  %v1874_v29 = vpop.permute.xlu1 %850  ;;  %v946_v28 = vsel %vm268_vm2, %v943_v33, %v941_v55  ;;  %v991_v30 = vrot.slane %v940_v60, 1  ;;  %v942_v31 = vrot.slane %v938_v6, 7 }
 0x154   : > { %v849_v54 = vpop.permute.xlu0 %848  ;;  %v874_v10 = vsub.f32 -6.8351846, %v871_v27  ;;  %v919_v13 = vmul.f32 %v898_v58, %v898_v58  ;;  %v948_v35 = vsel %vm2189_vm5, %v946_v28, %v1847_v32  ;;  %vm389_vm7 = vcmp.lt.s32.totalorder %v1712_v43, 32 }
 0x155   : > { %v920_v34 = vmul.f32 %v899_v41, %v899_v41  ;;  %v994_v45 = vsel %vm2191_vm9, %v991_v30, %v989_v21  ;;  %v951_v9 = vsub.f32 %v948_v35, %v1450_v23  ;;  %v944_v2 = vsel %vm268_vm2, %v942_v31, %v943_v33  ;;  %vm1976_vm3 = vmand %vm393_vm10, %vm389_vm7 }
 0x156   : > { %v945_v39 = vsel %vm268_vm2, %v941_v55, %v942_v31  ;;  %v875_v40 = vmul.f32 1.442695, %v874_v10  ;;  %v924_v42 = vadd.f32 %v919_v13, %v918_v0  ;;  %v997_v44 = vsel %vm2189_vm5, %v940_v60, %v994_v45  ;;  %v1935_v10 = vld [vmem:[%s1247_s21] sm:$0xff] }
 0x157   : > { %v949_v5 = vsel %vm2189_vm5, %v945_v39, %v938_v6  ;;  %v1893_v59 = vpop.permute.xlu1 %902  ;;  %v1896_v37 = vpop.eup %1157  ;;  %1161 = vpow2.f32 %v821_v3  ;;  %v972_v49 = vmul.f32 %v951_v9, %v951_v9  ;;  %v950_v55 = vsel %vm2189_vm5, %v944_v2, %v940_v60 }
 0x158   : > { %v952_v36 = vsub.f32 %v949_v5, %v1442_v57  ;;  %v925_v61 = vadd.f32 %v924_v42, %v920_v34  ;;  %v1000_v52 = vsub.f32 %v997_v44, %v1462_v17  ;;  %v953_v63 = vsub.f32 %v950_v55, %v1462_v17  ;;  %v1904_v14 = vpop.permute.xlu0 %900  ;;  %v1950_v44 = vld [vmem:[%s1247_s21 + $0x8] sm:$0xff] }
 0x159   : > { %v990_v33 = vrot.slane %v938_v6, 1  ;;  %1163 = vpow2.f32 %v875_v40  ;;  %v854_v16 = vrot.slane %v1874_v29, 7  ;;  %v853_v18 = vrot.slane %v849_v54, 7 }
 0x15a   : > { %v973_v15 = vmul.f32 %v952_v36, %v952_v36  ;;  %v928_v60 = vsub.f32 -6.8351846, %v925_v61  ;;  %v974_v4 = vmul.f32 %v953_v63, %v953_v63  ;;  %v907_v55 = vrot.slane %v1893_v59, 1 }
 0x15b   : > { %v992_v19 = vsel %vm2191_vm9, %v990_v33, %v991_v30  ;;  %v993_v17 = vsel %vm2191_vm9, %v989_v21, %v990_v33  ;;  %v1913_v3 = vpop.permute.xlu1 %954  ;;  %v1916_v27 = vpop.eup %1159  ;;  %v857_v28 = vsel %vm268_vm2, %v854_v16, %v852_v26  ;;  %v855_v34 = vsel %vm268_vm2, %v853_v18, %v854_v16 }
 0x15c   : > { %v978_v58 = vadd.f32 %v973_v15, %v972_v49  ;;  %v995_v41 = vsel %vm2189_vm5, %v1847_v32, %v993_v17  ;;  %v996_v0 = vsel %vm2189_vm5, %v938_v6, %v992_v19  ;;  %v929_v21 = vmul.f32 1.442695, %v928_v60  ;;  %v905_v2 = vpop.permute.xlu0 %904  ;;  %v1954_v49 = vld [vmem:[%s1247_s21 + $0x10] sm:$0xff]  ;;  %vm2001_vm5 = vmand %vm404_vm15, %vm406_vm12 }
 0x15d   : > { %v998_v30 = vsub.f32 %v995_v41, %v1450_v23  ;;  %v999_v31 = vsub.f32 %v996_v0, %v1442_v57  ;;  %v858_v32 = vsel %vm839_vm11, %v857_v28, %v1657_v1  ;;  %v856_v57 = vsel %vm268_vm2, %v852_v26, %v853_v18 }
 0x15e   : > { %v979_v6 = vadd.f32 %v978_v58, %v974_v4  ;;  %v861_v13 = vsub.f32 %v858_v32, %v1935_v10  ;;  %v1015_v23 = vmul.f32 %v1000_v52, %v1000_v52  ;;  %v859_v9 = vsel %vm839_vm11, %v856_v57, %v849_v54 }
 0x15f   : > { %v1013_v35 = vmul.f32 %v998_v30, %v998_v30  ;;  %v1014_v45 = vmul.f32 %v999_v31, %v999_v31  ;;  %v860_v42 = vsel %vm839_vm11, %v855_v34, %v1874_v29  ;;  %v862_v1 = vsub.f32 %v859_v9, %v1950_v44  ;;  %v1959_v36 = vpop.permute.xlu1 %958  ;;  %vm1965_vm11 = vmand %vm391_vm6, %vm389_vm7 }
 0x160   : > { %v982_v39 = vsub.f32 -6.802395, %v979_v6  ;;  %v867_v40 = vand.u32 2147483647, %v861_v13  ;;  %v863_v26 = vsub.f32 %v860_v42, %v1954_v49  ;;  %v906_v54 = vrot.slane %v1904_v14, 1  ;;  %vm1987_vm6 = vmand %vm402_vm8, %vm2190_vm14 }
 0x161   : > { %v1019_v5 = vadd.f32 %v1014_v45, %v1013_v35  ;;  %v1969_v61 = vpop.eup %1161  ;;  %1165 = vpow2.f32 %v929_v21  ;;  %v868_v63 = vand.u32 2147483647, %v862_v1  ;;  %v960_v33 = vrot.slane %v1913_v3, 7 }
 0x162   : > { %v983_v52 = vmul.f32 1.442695, %v982_v39  ;;  %v910_v18 = vsel %vm2191_vm9, %v906_v54, %v907_v55  ;;  %v1001_v60 = vrot.slane %v1913_v3, 1  ;;  %v908_v4 = vrot.slane %v905_v2, 1 }
 0x163   : > { %v1020_v16 = vadd.f32 %v1019_v5, %v1015_v23  ;;  %v1991_v17 = vpop.eup %1163  ;;  %v869_v58 = vand.u32 2147483647, %v863_v26  ;;  %v872_v41 = vadd.f32 %v868_v63, %v867_v40  ;;  %v912_v0 = vsel %vm893_vm4, %v1904_v14, %v910_v18  ;;  %v957_v14 = vpop.permute.xlu0 %956 }
 0x164   : > { %v962_v28 = vrot.slane %v1959_v36, 7  ;;  %v915_v31 = vsub.f32 %v912_v0, %v1935_v10  ;;  %v909_v32 = vsel %vm2191_vm9, %v907_v55, %v908_v4  ;;  %v911_v6 = vsel %vm2191_vm9, %v908_v4, %v906_v54 }
 0x165   : > { %v1023_v30 = vsub.f32 -6.802395, %v1020_v16  ;;  %vm2204_vm8 = vcmp.lt.s32.totalorder %v1712_v43, 30  ;;  %1167 = vpow2.f32 %v983_v52  ;;  %v913_v34 = vsel %vm893_vm4, %v1893_v59, %v909_v32 }
 0x166   : > { %vm2014_vm14 = vmand %vm393_vm10, %vm2204_vm8  ;;  %v914_v57 = vsel %vm893_vm4, %v905_v2, %v911_v6  ;;  %v965_v23 = vsel %vm268_vm2, %v962_v28, %v960_v33  ;;  %vm2207_vm12 = vcmp.lt.s32.totalorder %v1730_v24, 30  ;;  %v873_v9 = vadd.f32 %v872_v41, %v869_v58 }
 0x167   : > { %vm2029_vm9 = vmand %vm404_vm15, %vm2207_vm12  ;;  %v1024_v45 = vmul.f32 1.442695, %v1023_v30  ;;  %v916_v39 = vsub.f32 %v913_v34, %v1950_v44  ;;  %v917_v59 = vsub.f32 %v914_v57, %v1954_v49  ;;  %vm2212_vm15 = vcmp.lt.s32.totalorder %v1308_v8, 66 }
 0x168   : > { %vm2039_vm10 = vmand %vm388_vm13, %vm389_vm7  ;;  %v966_v40 = vsel %vm2212_vm15, %v965_v23, %v1913_v3  ;;  %v1003_v42 = vrot.slane %v1959_v36, 1  ;;  %v961_v1 = vrot.slane %v957_v14, 7  ;;  %v1002_v5 = vrot.slane %v957_v14, 1 }
 0x169   : > { %vm2213_vm4 = vcmp.lt.s32.totalorder %v1730_v24, 32  ;;  %vm2214_vm8 = vcmp.ge.s32.totalorder %v1730_v24, 2  ;;  %1169 = vpow2.f32 %v1024_v45  ;;  %v921_v43 = vand.u32 2147483647, %v915_v31  ;;  %vm514_vm7 = vmand %vm1976_vm3, %vm2001_vm5 }
 0x16a   : > { %vm2051_vm12 = vmand %vm2214_vm8, %vm2213_vm4  ;;  %v922_v55 = vand.u32 2147483647, %v916_v39  ;;  %v969_v54 = vsub.f32 %v966_v40, %v1935_v10  ;;  %v923_v52 = vand.u32 2147483647, %v917_v59  ;;  %vm2217_vm13 = vcmp.lt.s32.totalorder %v1306_v7, 7 }
 0x16b   : > { %v1006_v63 = vsel %vm2217_vm13, %v1003_v42, %v1001_v60  ;;  %v964_v24 = vsel %vm268_vm2, %v960_v33, %v961_v1  ;;  %vm2218_vm15 = vmmov %vm2217_vm13  ;;  %vm2219_vm8 = vcmp.lt.s32.totalorder %v1308_v8, 66  ;;  %v963_v58 = vsel %vm268_vm2, %v961_v1, %v962_v28  ;;  %v1166_v33 = vpop.eup %1165 }
 0x16c   : > { %v1004_v16 = vsel %vm2218_vm15, %v1002_v5, %v1003_v42  ;;  %v926_v18 = vadd.f32 %v922_v55, %v921_v43  ;;  %v1009_v4 = vsel %vm2219_vm8, %v1959_v36, %v1006_v63  ;;  %vm2220_vm13 = vmmov %vm2219_vm8  ;;  %v975_v30 = vand.u32 2147483647, %v969_v54 }
 0x16d   : > { %v967_v41 = vsel %vm2220_vm13, %v964_v24, %v957_v14  ;;  %vm622_vm15 = vmand %vm1771_vm0, %vm1987_vm6  ;;  %v1012_v0 = vsub.f32 %v1009_v4, %v1954_v49  ;;  %vm2221_vm4 = vcmp.lt.s32.totalorder %v1306_v7, 7  ;;  %v513_v57 = vmul.f32 %v1803_v38, %v1500_v62 }
 0x16e   : > { %v970_v31 = vsub.f32 %v967_v41, %v1950_v44  ;;  %v1005_v32 = vsel %vm2221_vm4, %v1001_v60, %v1002_v5  ;;  %v927_v28 = vadd.f32 %v926_v18, %v923_v52  ;;  %vm2222_vm13 = vmmov %vm2219_vm8  ;;  %v621_v45 = vmul.f32 %v1833_v22, %v1547_v48 }
 0x16f   : > { %v1007_v6 = vsel %vm2219_vm8, %v1913_v3, %v1005_v32  ;;  %v1008_v34 = vsel %vm2222_vm13, %v957_v14, %v1004_v16  ;;  %vm729_vm4 = vmand %vm1976_vm3, %vm2029_vm9  ;;  %v1018_v7 = vand.u32 2147483647, %v1012_v0  ;;  %v567_v14 = vmul.f32 %v1810_v51, %v1532_v50  ;;  %v1168_v8 = vpop.eup %1167 }
 0x170   : > { %vm2223_vm2 = vmmov %vm2219_vm8  ;;  %v1010_v23 = vsub.f32 %v1007_v6, %v1935_v10  ;;  %v1011_v3 = vsub.f32 %v1008_v34, %v1950_v44  ;;  %v931_v62 = vmul.f32 %v1166_v33, %v927_v28  ;;  %v976_v38 = vand.u32 2147483647, %v970_v31 }
 0x171   : > { %v968_v60 = vsel %vm2223_vm2, %v963_v58, %v1959_v36  ;;  %vm783_vm8 = vmand %vm2039_vm10, %vm1987_vm6  ;;  %v515_v36 = vsel %vm514_vm7, %v513_v57, 0.0  ;;  %v675_v50 = vmul.f32 %v1856_v56, %v1579_v25  ;;  %v623_v51 = vsel %vm622_vm15, %v621_v45, 0.0 }
 0x172   : > { %v1016_v10 = vand.u32 2147483647, %v1010_v23  ;;  %v1017_v44 = vand.u32 2147483647, %v1011_v3  ;;  %vm932_vm13 = vmand %vm1771_vm0, %vm2051_vm12  ;;  %v728_v25 = vmul.f32 %v1896_v37, %v1603_v11  ;;  %v782_v22 = vmul.f32 %v1916_v27, %v1625_v12 }
 0x173   : > { %vm2224_vm2 = vmand %vm1965_vm11, %vm1987_vm6  ;;  %v823_v21 = vmul.f32 %v1969_v61, %v1627_v46  ;;  %v877_v11 = vmul.f32 %v1991_v17, %v873_v9  ;;  %v1170_v37 = vpop.eup %1169  ;;  %v933_v29 = vsel %vm932_vm13, %v931_v62, 0.0  ;;  %v980_v15 = vadd.f32 %v976_v38, %v975_v30 }
 0x174   : > { %v569_v48 = vsel %vm2224_vm2, %v567_v14, 0.0  ;;  %vm878_vm5 = vmand %vm1965_vm11, %vm2051_vm12  ;;  %v1021_v56 = vadd.f32 %v1017_v44, %v1016_v10  ;;  %v730_v27 = vsel %vm729_vm4, %v728_v25, 0.0  ;;  %v784_v53 = vsel %vm783_vm8, %v782_v22, 0.0 }
 0x175   : > { %vm2225_vm7 = vmand %vm2014_vm14, %vm1783_vm1  ;;  %v731_v39 = vadd.f32 %v730_v27, %v515_v36  ;;  %v785_v46 = vadd.f32 %v784_v53, %v569_v48  ;;  %v879_v61 = vsel %vm878_vm5, %v877_v11, 0.0  ;;  %v971_v35 = vsub.f32 %v968_v60, %v1954_v49 }
 0x176   : > { %v677_v47 = vsel %vm2225_vm7, %v675_v50, 0.0  ;;  %vm2226_vm0 = vmand %vm2014_vm14, %vm1987_vm6  ;;  %v1022_v9 = vadd.f32 %v1021_v56, %v1018_v7 }
 0x177   : > { %v678_v12 = vadd.f32 %v677_v47, %v1821_v20  ;;  %v825_v20 = vsel %vm2226_vm0, %v823_v21, 0.0  ;;  %v934_v40 = vadd.f32 %v933_v29, %v731_v39  ;;  %vm1027_vm9 = vmand %vm2014_vm14, %vm2051_vm12  ;;  %v977_v42 = vand.u32 2147483647, %v971_v35 }
 0x178   : > { %v826_v17 = vadd.f32 %v825_v20, %v623_v51  ;;  %v1026_v1 = vmul.f32 %v1170_v37, %v1022_v9  ;;  %vm986_vm1 = vmand %vm2039_vm10, %vm2051_vm12 }
 0x179   : > { %v880_v59 = vadd.f32 %v879_v61, %v678_v12  ;;  %v981_v43 = vadd.f32 %v980_v15, %v977_v42 }
 0x17a   : > { %v1028_v19 = vsel %vm1027_vm9, %v1026_v1, 0.0 }
 0x17b   : > { %v1030_v5 = vadd.f32 %v934_v40, %v880_v59  ;;  %v985_v55 = vmul.f32 %v1168_v8, %v981_v43  ;;  %v1029_v49 = vadd.f32 %v1028_v19, %v826_v17 }
 0x17d   : > { %v987_v54 = vsel %vm986_vm1, %v985_v55, 0.0 }
 0x17e   : > { %v988_v52 = vadd.f32 %v987_v54, %v785_v46 }
 0x180   : > { %v1031_v63 = vadd.f32 %v1029_v49, %v988_v52 }
 0x182   : > { %v1032_v24 = vadd.f32 %v1031_v63, %v1030_v5 }
 0x184   : > { %1033 = vadd.xlane.f32.xlu1 %v1032_v24 }
 0x19a   : > { %v361_v16 = vpop.xlane.xlu0 %360 }
 0x19b   : > { %v362_v13 = vrot.slane %v361_v16, 4 }
 0x19d   : > { %v363_v18 = vadd.f32 %v362_v13, %v361_v16 }
 0x19f   : > { %v364_v4 = vrot.slane %v363_v18, 2 }
 0x1a1   : > { %v365_v58 = vadd.f32 %v364_v4, %v363_v18 }
 0x1a3   : > { %v366_v41 = vrot.slane %v365_v58, 1 }
 0x1a5   : > { %v367_v33 = vadd.f32 %v366_v41, %v365_v58 }
 0x1a7   : > { %1120 = vpush %v367_v33 }
 0x1d8   : > { %s1121_s30 = spop %1120 }
 0x1d9   : > { %s369_s3 = smul.f32 0.00024414063, %s1121_s30 }
 0x211   : > { %v1034_v26 = vpop.xlane.xlu1 %1033 }
 0x212   : > { %v1035_v0 = vrot.slane %v1034_v26, 4 }
 0x214   : > { %v1036_v2 = vadd.f32 %v1035_v0, %v1034_v26 }
 0x216   : > { %v1037_v30 = vrot.slane %v1036_v2, 2 }
 0x218   : > { %v1038_v31 = vadd.f32 %v1037_v30, %v1036_v2 }
 0x21a   : > { %v1039_v32 = vrot.slane %v1038_v31, 1 }
 0x21c   : > { %v1040_v28 = vadd.f32 %v1039_v32, %v1038_v31 }
 0x21e   : > { %1124 = vpush %v1040_v28 }
 0x24f   : > { %s1125_s4 = spop %1124 }
 0x250   : > { %s1042_s8 = sadd.f32 %s1125_s4, %s369_s3 }
 0x252   : > { %v1043_v6 = vstv %s1042_s8 }
 0x253   : > { %1044 = vst [vmem:[%s159_s7] sm:$0x1] %v1043_v6 }
 0x254 PF: > { %s12_s9 = sadd.s32 1, %s1180_s9  }
 0x255   : > { %p9_p4 = scmp.ge.s32.totalorder %s12_s9, 4  }
 0x257   :  { %11 = sbr.rel (!%p9_p4) target bundleno = 1 (0x1), region = 61 }

</bundles_post_ra>
